<compile_context>
chip_gen: v5e
topology: v5e:2x2
jax: 0.10.0
libtpu: 0.0.40
codegen_flags: <defaults>
</compile_context>

<pallas_src>
import functools

import jax
import jax.numpy as jnp
from jax.experimental import pallas as pl
from jax.experimental.pallas import tpu as pltpu


def _qfl_kernel(pred_ref, label_ref, score_ref, out_ref, *, beta):
    """One (tile_n, C) block -> lane-dense (1, 1, tile_n) per-row loss sums."""
    x = pred_ref[...].astype(jnp.float32)           # (tn, C) logits (upcast in-kernel)
    label = label_ref[...]                           # (tn, 1) int32
    score = score_ref[...].astype(jnp.float32)       # (tn, 1)
    num_classes = x.shape[1]

    # ---- shared transcendentals (1x exp + 1x log1p per element) ----
    e = jnp.exp(-jnp.abs(x))
    base = jnp.maximum(x, 0.0) + jnp.log1p(e)         # stable BCEwithLogits(x, 0)
    inv = 1.0 / (1.0 + e)
    sig = jnp.where(x >= 0.0, inv, e * inv)           # sigmoid(x) from shared e

    # ---- modulating factor ^beta, trace-time specialized ----
    if beta == 2.0:
        def pow_fn(v):
            return v * v
    elif float(beta).is_integer() and 1 <= int(beta) <= 4:
        def pow_fn(v, _n=int(beta)):
            r = v
            for _ in range(_n - 1):
                r = r * v
            return r
    else:
        def pow_fn(v):
            return jnp.power(v, beta)

    # ---- dense background (negative) term ----
    neg = base * pow_fn(sig)                          # (tn, C)

    # ---- lazy positive correction on (tn, 1) vectors ----
    col = jax.lax.broadcasted_iota(jnp.int32, x.shape, 1)
    sel = col == label                                # exactly one column per positive row
    x_l = jnp.sum(jnp.where(sel, x, 0.0), axis=1, keepdims=True)
    sig_l = jnp.sum(jnp.where(sel, sig, 0.0), axis=1, keepdims=True)
    base_l = jnp.sum(jnp.where(sel, base, 0.0), axis=1, keepdims=True)

    neg_l = base_l * pow_fn(sig_l)
    pos_l = (base_l - x_l * score) * pow_fn(jnp.abs(score - sig_l))
    is_pos = (label >= 0) & (label < num_classes)
    corr = jnp.where(is_pos, pos_l - neg_l, 0.0)      # (tn, 1): subtract neg_l, add pos_l

    # Fold the per-row correction into column 0, then reduce once.
    loss_adj = jnp.where(col == 0, neg + corr, neg)   # (tn, C)

    # Lane-dense row sums: ones(8, C) . loss_adj^T -> (8, tn) on the (idle) MXU.
    ones_lhs = jnp.ones((8, num_classes), jnp.float32)
    row_sums = jax.lax.dot_general(
        ones_lhs, loss_adj,
        dimension_numbers=(((1,), (1,)), ((), ())),
        preferred_element_type=jnp.float32)           # (8, tn), rows identical
    out_ref[0] = row_sums[0:1, :]                     # (1, tn) unmasked lane-dense store


def _round_up(v, m):
    return ((v + m - 1) // m) * m


def _pick_tile_n(n, c, vmem_budget_bytes=4 << 20):
    """Row-tile size: big enough to amortize grid-step overhead, bounded by a
    conservative VMEM budget (double-buffered pred tile) that is safe on
    v5e (16 MiB default scoped), v6e (32 MiB) and v7x (64 MiB physical)."""
    per_row_bytes = max(c, 1) * 4
    cap_vmem = vmem_budget_bytes // (2 * per_row_bytes)
    cap_n = max((n + 1) // 2, 8)          # keep >=2 grid steps (v7x has 2 TCs/chip)
    t = max(8, min(1024, cap_vmem, cap_n))
    if t >= 128:
        t = (t // 128) * 128              # lane-dense output stores
    else:
        t = (t // 8) * 8                  # sublane alignment at minimum
    return int(t)


def quality_focal_loss_pallas(pred, label, score, *, beta=2.0, tile_n=None):
    """Per-row QFL loss, shape (N,). Hot path runs inside the Pallas kernel."""
    N, C = pred.shape
    if tile_n is None:
        tile_n = _pick_tile_n(N, C)
    n_tiles = pl.cdiv(N, tile_n)
    n_pad = n_tiles * tile_n

    label = label.astype(jnp.int32)
    score = score.astype(jnp.float32)
    if n_pad != N:
        pad = n_pad - N
        pred = jnp.pad(pred, ((0, pad), (0, 0)))
        label = jnp.pad(label, (0, pad), constant_values=C)   # background rows
        score = jnp.pad(score, (0, pad))

    label2d = label.reshape(n_pad, 1)
    score2d = score.reshape(n_pad, 1)

    kernel = functools.partial(_qfl_kernel, beta=float(beta))

    itemsize = jnp.dtype(pred.dtype).itemsize
    cost = pl.CostEstimate(
        flops=int(14 * n_pad * C + 2 * 8 * C * n_pad),
        transcendentals=int(2 * n_pad * C),
        bytes_accessed=int(n_pad * C * itemsize + n_pad * 8 + n_pad * 4),
    )

    out = pl.pallas_call(
        kernel,
        out_shape=jax.ShapeDtypeStruct((n_tiles, 1, tile_n), jnp.float32),
        grid=(n_tiles,),
        in_specs=[
            pl.BlockSpec((tile_n, C), lambda i: (i, 0)),
            pl.BlockSpec((tile_n, 1), lambda i: (i, 0)),
            pl.BlockSpec((tile_n, 1), lambda i: (i, 0)),
        ],
        out_specs=pl.BlockSpec((1, 1, tile_n), lambda i: (i, 0, 0)),
        compiler_params=pltpu.CompilerParams(
            dimension_semantics=("parallel",),
            vmem_limit_bytes=32 << 20,
        ),
        cost_estimate=cost,
    )(pred, label2d, score2d)

    return out.reshape(n_pad)[:N]


class QualityFocalLossPallas:
    """JAX/Pallas port of mmdet QualityFocalLoss (use_sigmoid=True only)."""

    def __init__(self, use_sigmoid=True, beta=2.0, reduction="mean",
                 loss_weight=1.0, activated=False):
        assert use_sigmoid is True, "Only sigmoid in QFL supported now."
        assert activated is False, "Only logits (activated=False) path implemented."
        self.beta = beta
        self.reduction = reduction
        self.loss_weight = loss_weight
        # TODO(synk): quality_focal_loss_with_prob / tensor-target variants not wired here.

    def __call__(self, pred, target, weight=None, avg_factor=None,
                 reduction_override=None):
        assert reduction_override in (None, "none", "mean", "sum")
        reduction = reduction_override if reduction_override else self.reduction
        label, score = target

        loss = quality_focal_loss_pallas(pred, label, score, beta=self.beta)

        # weighted_loss glue (plain JAX): elementwise weight then reduction.
        if weight is not None:
            loss = loss * weight.astype(loss.dtype)

        if reduction == "none":
            out = loss
        elif reduction == "sum":
            out = jnp.sum(loss)
        else:  # mean
            if avg_factor is None:
                out = jnp.mean(loss)
            else:
                out = jnp.sum(loss) / avg_factor
        return self.loss_weight * out


def _reference_qfl(pred, label, score, beta=2.0):
    """Pure-JAX reference mirroring the PyTorch implementation."""
    C = pred.shape[1]
    sig = jax.nn.sigmoid(pred)
    base = jnp.maximum(pred, 0.0) + jnp.log1p(jnp.exp(-jnp.abs(pred)))
    neg = base * sig ** beta
    score_b = score[:, None]
    pos = (base - pred * score_b) * jnp.abs(score_b - sig) ** beta
    col = jnp.arange(C)[None, :]
    mask = ((label >= 0) & (label < C))[:, None] & (col == label[:, None])
    return jnp.where(mask, pos, neg).sum(axis=1)


if __name__ == "__main__":
    key = jax.random.PRNGKey(0)
    k1, k2, k3, k4 = jax.random.split(key, 4)

    # Small shapes; N deliberately NOT a multiple of the tile to exercise padding.
    N, C = 300, 16
    pred = jax.random.normal(k1, (N, C), dtype=jnp.float32) * 2.0
    # labels in [0, C]; label == C means background (no positive override)
    label = jax.random.randint(k2, (N,), 0, C + 1, dtype=jnp.int32)
    score = jax.random.uniform(k3, (N,), dtype=jnp.float32)
    weight = jax.random.uniform(k4, (N,), dtype=jnp.float32)

    # per-row check against the pure-JAX reference
    per_row = quality_focal_loss_pallas(pred, label, score, beta=2.0)
    per_row = jax.block_until_ready(per_row)
    ref_rows = _reference_qfl(pred, label, score, beta=2.0)
    assert per_row.shape == (N,)
    assert jnp.allclose(per_row, ref_rows, rtol=1e-4, atol=1e-4), (
        float(jnp.max(jnp.abs(per_row - ref_rows))))

    # module-level check (weighted, mean reduction with avg_factor)
    loss_mod = QualityFocalLossPallas(use_sigmoid=True, beta=2.0,
                                      reduction="mean", loss_weight=1.0)
    out = loss_mod(pred, (label, score), weight=weight, avg_factor=37.0)
    out = jax.block_until_ready(out)
    ref = jnp.sum(ref_rows * weight) / 37.0
    assert jnp.allclose(out, ref, rtol=1e-4, atol=1e-4), (out, ref)

    print("KERNEL_OK")
</pallas_src>

<mosaic_0001>
module attributes {stable_mosaic.version = 11 : i64} {
  func.func @_qfl_kernel(%arg0: i32, %arg1: memref<128x16xf32, #tpu.memory_space<vmem>>, %arg2: memref<128x1xi32, #tpu.memory_space<vmem>>, %arg3: memref<128x1xf32, #tpu.memory_space<vmem>>, %arg4: memref<1x1x128xf32, #tpu.memory_space<vmem>>) attributes {dimension_semantics = [#tpu.dimension_semantics<parallel>], iteration_bounds = array<i64: 3>, scalar_prefetch = 0 : i64, scratch_operands = 0 : i64, tpu.core_type = #tpu.core_type<tc>, window_params = [{transform_indices = @transform_0, window_bounds = array<i64: 128, 16>}, {transform_indices = @transform_1, window_bounds = array<i64: 128, 1>}, {transform_indices = @transform_2, window_bounds = array<i64: 128, 1>}, {transform_indices = @transform_3, window_bounds = array<i64: 1, 1, 128>}]} {
    %c0 = arith.constant 0 : index
    %c0_0 = arith.constant 0 : index
    %0 = vector.load %arg1[%c0, %c0_0] : memref<128x16xf32, #tpu.memory_space<vmem>>, vector<128x16xf32>
    %c0_1 = arith.constant 0 : index
    %c0_2 = arith.constant 0 : index
    %1 = vector.load %arg2[%c0_1, %c0_2] : memref<128x1xi32, #tpu.memory_space<vmem>>, vector<128x1xi32>
    %c0_3 = arith.constant 0 : index
    %c0_4 = arith.constant 0 : index
    %2 = vector.load %arg3[%c0_3, %c0_4] : memref<128x1xf32, #tpu.memory_space<vmem>>, vector<128x1xf32>
    %3 = math.absf %0 : vector<128x16xf32>
    %cst = arith.constant 0.000000e+00 : f32
    %4 = vector.broadcast %cst : f32 to vector<128x16xf32>
    %5 = arith.subf %4, %3 : vector<128x16xf32>
    %6 = math.exp %5 : vector<128x16xf32>
    %cst_5 = arith.constant 0.000000e+00 : f32
    %7 = vector.broadcast %cst_5 : f32 to vector<128x16xf32>
    %8 = arith.maximumf %0, %7 : vector<128x16xf32>
    %9 = math.log1p %6 : vector<128x16xf32>
    %10 = arith.addf %8, %9 : vector<128x16xf32>
    %cst_6 = arith.constant 1.000000e+00 : f32
    %11 = vector.broadcast %cst_6 : f32 to vector<128x16xf32>
    %12 = arith.addf %11, %6 : vector<128x16xf32>
    %cst_7 = arith.constant 1.000000e+00 : f32
    %13 = vector.broadcast %cst_7 : f32 to vector<128x16xf32>
    %14 = arith.divf %13, %12 : vector<128x16xf32>
    %cst_8 = arith.constant 0.000000e+00 : f32
    %15 = vector.broadcast %cst_8 : f32 to vector<128x16xf32>
    %16 = arith.cmpf oge, %0, %15 : vector<128x16xf32>
    %17 = arith.mulf %6, %14 : vector<128x16xf32>
    %18 = arith.select %16, %14, %17 : vector<128x16xi1>, vector<128x16xf32>
    %19 = arith.mulf %18, %18 : vector<128x16xf32>
    %20 = arith.mulf %10, %19 : vector<128x16xf32>
    %21 = tpu.iota {dimensions = array<i32: 1>} : vector<128x16xi32>
    %22 = vector.broadcast %1 : vector<128x1xi32> to vector<128x16xi32>
    %23 = arith.cmpi eq, %21, %22 : vector<128x16xi32>
    %cst_9 = arith.constant 0.000000e+00 : f32
    %24 = vector.broadcast %cst_9 : f32 to vector<128x16xf32>
    %25 = arith.select %23, %0, %24 : vector<128x16xi1>, vector<128x16xf32>
    %cst_10 = arith.constant dense<0.000000e+00> : vector<128xf32>
    %26 = vector.multi_reduction <add>, %25, %cst_10 [1] : vector<128x16xf32> to vector<128xf32>
    %27 = vector.shape_cast %26 : vector<128xf32> to vector<128x1xf32>
    %cst_11 = arith.constant 0.000000e+00 : f32
    %28 = vector.broadcast %cst_11 : f32 to vector<128x16xf32>
    %29 = arith.select %23, %18, %28 : vector<128x16xi1>, vector<128x16xf32>
    %cst_12 = arith.constant dense<0.000000e+00> : vector<128xf32>
    %30 = vector.multi_reduction <add>, %29, %cst_12 [1] : vector<128x16xf32> to vector<128xf32>
    %31 = vector.shape_cast %30 : vector<128xf32> to vector<128x1xf32>
    %cst_13 = arith.constant 0.000000e+00 : f32
    %32 = vector.broadcast %cst_13 : f32 to vector<128x16xf32>
    %33 = arith.select %23, %10, %32 : vector<128x16xi1>, vector<128x16xf32>
    %cst_14 = arith.constant dense<0.000000e+00> : vector<128xf32>
    %34 = vector.multi_reduction <add>, %33, %cst_14 [1] : vector<128x16xf32> to vector<128xf32>
    %35 = vector.shape_cast %34 : vector<128xf32> to vector<128x1xf32>
    %36 = arith.mulf %31, %31 : vector<128x1xf32>
    %37 = arith.mulf %35, %36 : vector<128x1xf32>
    %38 = arith.mulf %27, %2 : vector<128x1xf32>
    %39 = arith.subf %35, %38 : vector<128x1xf32>
    %40 = arith.subf %2, %31 : vector<128x1xf32>
    %41 = math.absf %40 : vector<128x1xf32>
    %42 = arith.mulf %41, %41 : vector<128x1xf32>
    %43 = arith.mulf %39, %42 : vector<128x1xf32>
    %c0_i32 = arith.constant 0 : i32
    %44 = vector.broadcast %c0_i32 : i32 to vector<128x1xi32>
    %45 = arith.cmpi sge, %1, %44 : vector<128x1xi32>
    %c16_i32 = arith.constant 16 : i32
    %46 = vector.broadcast %c16_i32 : i32 to vector<128x1xi32>
    %47 = arith.cmpi slt, %1, %46 : vector<128x1xi32>
    %48 = arith.andi %45, %47 : vector<128x1xi1>
    %49 = arith.subf %43, %37 : vector<128x1xf32>
    %cst_15 = arith.constant 0.000000e+00 : f32
    %50 = vector.broadcast %cst_15 : f32 to vector<128x1xf32>
    %51 = arith.select %48, %49, %50 : vector<128x1xi1>, vector<128x1xf32>
    %c0_i32_16 = arith.constant 0 : i32
    %52 = vector.broadcast %c0_i32_16 : i32 to vector<128x16xi32>
    %53 = arith.cmpi eq, %21, %52 : vector<128x16xi32>
    %54 = vector.broadcast %51 : vector<128x1xf32> to vector<128x16xf32>
    %55 = arith.addf %20, %54 : vector<128x16xf32>
    %56 = arith.select %53, %55, %20 : vector<128x16xi1>, vector<128x16xf32>
    %cst_17 = arith.constant 1.000000e+00 : f32
    %57 = vector.broadcast %cst_17 : f32 to vector<8x16xf32>
    %cst_18 = arith.constant dense<0.000000e+00> : vector<8x128xf32>
    %58 = tpu.matmul %57, %56, %cst_18 {dimension_numbers = #tpu.dot_dimension_numbers<[1], [1], [0], [0], [0, 0, 1, 0], [], []>} : vector<8x16xf32>, vector<128x16xf32>, vector<8x128xf32> -> vector<8x128xf32>
    %59 = vector.extract_strided_slice %58 {offsets = [0, 0], sizes = [1, 128], strides = [1, 1]} : vector<8x128xf32> to vector<1x128xf32>
    %c0_19 = arith.constant 0 : index
    %c0_20 = arith.constant 0 : index
    %c0_21 = arith.constant 0 : index
    %60 = vector.load %arg4[%c0_19, %c0_20, %c0_21] : memref<1x1x128xf32, #tpu.memory_space<vmem>>, vector<1x1x128xf32>
    %61 = vector.shape_cast %60 : vector<1x1x128xf32> to vector<1x128xf32>
    %62 = vector.shape_cast %59 : vector<1x128xf32> to vector<1x1x128xf32>
    tpu.vector_store %arg4[%c0_19, %c0_20, %c0_21], %62 {strides = array<i32>} : memref<1x1x128xf32, #tpu.memory_space<vmem>>, vector<1x1x128xf32>,
    return
  }
  func.func @transform_0(%arg0: i32) -> (i32, i32) {
    %c0_i32 = arith.constant 0 : i32
    %c0_i32_0 = arith.constant 0 : i32
    return %arg0, %c0_i32 : i32, i32
  }
  func.func @transform_1(%arg0: i32) -> (i32, i32) {
    %c0_i32 = arith.constant 0 : i32
    %c0_i32_0 = arith.constant 0 : i32
    return %arg0, %c0_i32 : i32, i32
  }
  func.func @transform_2(%arg0: i32) -> (i32, i32) {
    %c0_i32 = arith.constant 0 : i32
    %c0_i32_0 = arith.constant 0 : i32
    return %arg0, %c0_i32 : i32, i32
  }
  func.func @transform_3(%arg0: i32) -> (i32, i32, i32) {
    %c0_i32 = arith.constant 0 : i32
    %c0_i32_0 = arith.constant 0 : i32
    %c0_i32_1 = arith.constant 0 : i32
    return %arg0, %c0_i32, %c0_i32_0 : i32, i32, i32
  }
}

</mosaic_0001>

<bundles_post_ra>
// kernel: tpu_custom_call.1
= control target key start
LH: loop header
LB: loop body
LE: loop exit
PB: predicated region body
PF: predicated region fallthrough
CT: control target
= control target key end

     0   :  { %8 = vsyncpa [#allocation3], 0  ;;  %s3270_s0 = inlined_call_operand.vmem [shape: f32[384,16], index: 0, kind: input, shape index: {}]   ;;  %s3271_s1 = inlined_call_operand.vmem [shape: s32[384,1], index: 1, kind: input, shape index: {}]   ;;  %s3272_s2 = inlined_call_operand.vmem [shape: f32[384,1], index: 2, kind: input, shape index: {}]   ;;  %s3273_s3 = inlined_call_operand.hbm [shape: f32[3,1,128], index: 3, kind: output, shape index: {}]  }
   0x1   :  { %10 = vsyncpa [#allocation3 + $0x1], 0  ;;  %s1853_s12 = smov 0   ;;  %s1855_s13 = smov 0  }
   0x2   :  { %s1857_s14 = smov 0   ;;  %s1859_s15 = smov 0  }
   0x3 LB: > { %s1874_s16 = sadd.s32 4294967295, %s1829_s15   ;;  %s1582_s17 = sadd.s32 4294967294, %s1829_s15   ;;  %s1829_s15 = sphi %s1859_s15, %s3378_s15   ;;  %s1825_s14 = sphi %s1857_s14, %s3377_s14   ;;  %s1821_s13 = sphi %s1855_s13, %s3376_s13   ;;  %s1817_s12 = sphi %s1853_s12, %s3375_s12  }
   0x4   : > { %s1878_s18 = sadd.s32 1, %s1829_s15   ;;  %s101_s19 = sadd.s32 1, %s1825_s14 }
   0x5   : > { %s98_s20 = ssub.s32 %s1829_s15, %s1878_s18  ;;  %p111_p0 = scmp.ne.s32.totalorder %s1825_s14, %s1821_s13 }
   0x6   : > { %p99_p1 = scmp.eq.s32.totalorder %s98_s20, 0  ;;  %p112_p2 = scmp.eq.s32.totalorder %s1874_s16, 2 }
   0x7   : > { %p117_p3 = scmp.ne.s32.totalorder %s1821_s13, %s1817_s12  ;;  %p118_p4 = scmp.eq.s32.totalorder %s1582_s17, 2 }
   0x8   : > { %s1889_s21 = scalar_select %p99_p1, %s1825_s14, %s101_s19  }
   0x9   : > { %p1891_p5 = por %p112_p2, %p111_p0  ;;  %p1895_p6 = por %p118_p4, %p117_p3 }
   0xa   : > { %p1585_p7 = scmp.ge.s32.totalorder %s1829_s15, 1  ;;  %p163_p8 = scmp.lt.s32.totalorder %s1829_s15, 4 }
   0xc   : > { %p164_p9 = pnand %p1585_p7, %p163_p8 }
   0xe   : > { %167 = sbr.rel (%p164_p9) target bundleno = 720 (0x2d0), region = 32 }
  0x13   : > { %s1586_s24 = sshll.u32 %s1874_s16, 4  ;;  %v1831_v0 = vmov 0   ;;  %vm920_vm6 = vcmask 130048   ;;  %s194_s8 = sand.u32 1, %s1821_s13  }
  0x14   : > { %1654 = vset.pattern.permute.xlu2 %v1831_v0  ;;  %1653 = vset.pattern.permute.xlu1 %v1831_v0  ;;  %p197_p10 = scmp.lt.s32.totalorder %s1586_s24, 47  ;;  %s1499_s11 = scalar_lea.hbm %s3273_s3, %s1874_s16 }
  0x15   : > { %1652 = vset.pattern.permute.xlu0 %v1831_v0  ;;  %s195_s17 = scalar_lea.vmem [#allocation2], %s194_s8  ;;  %s1503_s20 = sshll.u32 %s1499_s11, 4  ;;  %s1504_s20 = int_to_ptr.hbm [resolvable:$true] %s1503_s20 }
  0x16   : > { %s3380_s24 = smov (!%p197_p10, %s1586_s24), 47  ;;  %s1501_s19 = sshll.u32 %s195_s17, 4  ;;  %s1502_s19 = int_to_ptr.vmem [resolvable:$true] %s1501_s19 }
  0x17   : > { %s1902_s25 = sshll.u32 %s3380_s24, 3  ;;  %s1491_s24 = scalar_lea.sflag [#allocation3], %s194_s8 }
  0x18   : > { %s1908_s28 = scalar_lea.vmem %s3271_s1, %s1902_s25  ;;  %s1930_s4 = scalar_lea.vmem %s3270_s0, %s1902_s25 }
  0x19   : > { %v234_v1 = vld [vmem:[%s1908_s28 + $0x20] sm:$0xff]  ;;  %v232_v2 = vld [vmem:[%s1908_s28 + $0x10] sm:$0xff]  ;;  %v245_v4 = vld [vmem:[%s1908_s28 + $0x78] sm:$0xff]  ;;  %s2940_s7 = scalar_lea.vmem %s3272_s2, %s1902_s25  ;;  %s1781_s25 = sshra.s32 %s1504_s20, 4  ;;  %s1782_s25 = int_to_ptr.hbm [resolvable:$true] %s1781_s25 }
  0x1a   : > { %v230_v3 = vld [vmem:[%s1908_s28] sm:$0xff]  ;;  %853 = vperm.xlu2 %1654, %v234_v1   ;;  %847 = vperm.xlu1 %1653, %v232_v2   ;;  %v233_v5 = vld [vmem:[%s1908_s28 + $0x18] sm:$0xff]  ;;  %v231_v6 = vld [vmem:[%s1908_s28 + $0x8] sm:$0xff]  ;;  %s1783_s26 = scalar_lea.hbm %s1782_s25, 1  ;;  %s1787_s29 = scalar_lea.hbm %s3273_s3, 3 }
  0x1b   : > { %841 = vperm.xlu0 %1652, %v230_v3   ;;  %v242_v7 = vld [vmem:[%s1908_s28 + $0x60] sm:$0xff]  ;;  %v243_v8 = vld [vmem:[%s1908_s28 + $0x68] sm:$0xff]  ;;  %v244_v9 = vld [vmem:[%s1908_s28 + $0x70] sm:$0xff]  ;;  %p1784_p11 = scmp.ne.s32.totalorder %s1782_s25, %s1783_s26  ;;  %p1788_p0 = scmp.lt.s32.totalorder %s1782_s25, %s3273_s3 }
  0x1c   : > { %v239_v10 = vld [vmem:[%s1908_s28 + $0x48] sm:$0xff]  ;;  %v240_v11 = vld [vmem:[%s1908_s28 + $0x50] sm:$0xff]  ;;  %v241_v12 = vld [vmem:[%s1908_s28 + $0x58] sm:$0xff]  ;;  %p1789_p1 = scmp.lt.s32.totalorder %s1787_s29, %s1783_s26 }
  0x1d   : > { %v236_v13 = vld [vmem:[%s1908_s28 + $0x30] sm:$0xff]  ;;  %v237_v14 = vld [vmem:[%s1908_s28 + $0x38] sm:$0xff]  ;;  %v238_v15 = vld [vmem:[%s1908_s28 + $0x40] sm:$0xff]  ;;  %p1785_p12 = pnand %p1784_p11, %p1891_p5 }
  0x1e   : > { %v235_v16 = vld [vmem:[%s1908_s28 + $0x28] sm:$0xff]  ;;  %v1933_v17 = vld [vmem:[%s1930_s4 + $0x78] sm:$0xff]  ;;  %v1937_v21 = vld [vmem:[%s1930_s4 + $0x60] sm:$0xff]  ;;  %p1790_p2 = por %p1789_p1, %p1788_p0 }
  0x1f   : > { %v277_v18 = vand.u32 2147483647, %v1933_v17  ;;  %v274_v22 = vand.u32 2147483647, %v1937_v21  ;;  %v1944_v27 = vld [vmem:[%s1930_s4 + $0x70] sm:$0xff]  ;;  %v1947_v28 = vld [vmem:[%s1930_s4 + $0x68] sm:$0xff]  ;;  %p1786_p13 = pneg %p1785_p12 }
  0x20   : > { %v276_v29 = vand.u32 2147483647, %v1944_v27  ;;  %v275_v30 = vand.u32 2147483647, %v1947_v28  ;;  %v1954_v38 = vld [vmem:[%s1930_s4 + $0x48] sm:$0xff]  ;;  %v1963_v44 = vld [vmem:[%s1930_s4 + $0x58] sm:$0xff] }
  0x21   : > { %v293_v19 = vsub.f32 0.0, %v277_v18  ;;  %v290_v23 = vsub.f32 0.0, %v274_v22  ;;  %v271_v41 = vand.u32 2147483647, %v1954_v38  ;;  %v273_v49 = vand.u32 2147483647, %v1963_v44  ;;  %p1791_p3 = pnand %p1790_p2, %p1786_p13 }
  0x22   : > { %886 = vperm.xlu2 %1654, %v245_v4   ;;  %850 = vperm.xlu1 %1653, %v233_v5   ;;  %v292_v31 = vsub.f32 0.0, %v276_v29  ;;  %v291_v32 = vsub.f32 0.0, %v275_v30  ;;  %v1980_v54 = vld [vmem:[%s1930_s4 + $0x50] sm:$0xff]  ;;  %vm773_vm4 = vcmp.ge.f32.partialorder %v1933_v17, 0.0 }
  0x23   : > { %844 = vperm.xlu0 %1652, %v231_v6   ;;  %v324_v20 = vmul.f32 1.442695, %v293_v19  ;;  %v318_v26 = vmul.f32 1.442695, %v290_v23  ;;  %v287_v47 = vsub.f32 0.0, %v271_v41  ;;  %v289_v59 = vsub.f32 0.0, %v273_v49 }
  0x24   : > { %v322_v34 = vmul.f32 1.442695, %v292_v31  ;;  %v320_v35 = vmul.f32 1.442695, %v291_v32  ;;  %v272_v61 = vand.u32 2147483647, %v1980_v54  ;;  %v838_v6 = vlaneseq }
  0x25   : > { %1655 = vpow2.f32 %v324_v20  ;;  %v312_v56 = vmul.f32 1.442695, %v287_v47  ;;  %v316_v4 = vmul.f32 1.442695, %v289_v59  ;;  %v341_v19 = vmax.f32 %v1933_v17, 0.0 }
  0x2a   : > { %877 = vperm.xlu2 %1654, %v242_v7   ;;  %880 = vperm.xlu1 %1653, %v243_v8   ;;  %v288_v7 = vsub.f32 0.0, %v272_v61 }
  0x2b   : > { %883 = vperm.xlu0 %1652, %v244_v9   ;;  %v1940_v24 = vpop.eup %1655 }
  0x2c   : > { %v477_v25 = vadd.f32 1.0, %v1940_v24  ;;  %v480_v55 = vmul.f32 -0.5, %v1940_v24  ;;  %v483_v3 = vand.u32 2147483647, %v1940_v24  ;;  %v314_v18 = vmul.f32 1.442695, %v288_v7 }
  0x2e   : > { %1657 = vrcp.f32 %v477_v25  ;;  %vm748_vm0 = vweird.f32 %v477_v25  ;;  %v754_v48 = vand.u32 2147483648, %v477_v25  ;;  %v752_v51 = vand.u32 2147483647, %v477_v25 }
  0x2f   : > { %1659 = vpow2.f32 %v318_v26  ;;  %v481_v62 = vadd.f32 1.0, %v480_v55  ;;  %vm2002_vm5 = vcmp.lt.f32.partialorder %v483_v3, 0.0004427343 }
  0x30   : > { %1661 = vpow2.f32 %v322_v34  ;;  %v755_v58 = vor.u32 1.1754944e-38, %v754_v48  ;;  %vm753_vm3 = vcmp.eq.f32.partialorder %v752_v51, 8.507059e+37 }
  0x31   : > { %1663 = vpow2.f32 %v320_v35 }
  0x32   : > { %868 = vperm.xlu2 %1654, %v239_v10   ;;  %871 = vperm.xlu1 %1653, %v240_v11   ;;  %v482_v11 = vmul.f32 %v1940_v24, %v481_v62 }
  0x33   : > { %874 = vperm.xlu0 %1652, %v241_v12  }
  0x34   : > { %v1658_v33 = vpop.eup %1657 }
  0x35   : > { %v744_v36 = vmul.f32 %v1658_v33, %v477_v25  ;;  %v1951_v37 = vpop.eup %1659  ;;  %vm749_vm1 = vweird.f32 %v1658_v33 }
  0x36   : > { %v1957_v40 = vadd.f32 1.0, %v1951_v37  ;;  %v1960_v42 = vpop.eup %1661  ;;  %vm1975_vm2 = vmor %vm748_vm0, %vm749_vm1  ;;  %v453_v7 = vmul.f32 -0.5, %v1951_v37 }
  0x37   : > { %v745_v39 = vsub.f32 1.0, %v744_v36  ;;  %v1965_v45 = vpop.eup %1663  ;;  %v1969_v46 = vadd.f32 1.0, %v1960_v42 }
  0x38   : > { %1665 = vrcp.f32 %v1957_v40  ;;  %v1973_v52 = vadd.f32 1.0, %v1965_v45  ;;  %vm703_vm8 = vweird.f32 %v1957_v40  ;;  %v707_v41 = vand.u32 2147483647, %v1957_v40 }
  0x39   : > { %v746_v43 = vmul.f32 %v1658_v33, %v745_v39  ;;  %1667 = vlog2.f32 %v477_v25  ;;  %v709_v47 = vand.u32 2147483648, %v1957_v40  ;;  %vm733_vm11 = vweird.f32 %v1969_v46 }
  0x3a   : > { %859 = vperm.xlu2 %1654, %v236_v13   ;;  %862 = vperm.xlu1 %1653, %v237_v14   ;;  %1669 = vrcp.f32 %v1969_v46  ;;  %v739_v53 = vand.u32 2147483648, %v1969_v46  ;;  %vm2066_vm13 = vcmp.eq.f32.partialorder %v707_v41, 8.507059e+37  ;;  %vm718_vm14 = vweird.f32 %v1973_v52 }
  0x3b   : > { %865 = vperm.xlu0 %1652, %v238_v15   ;;  %v747_v50 = vadd.f32 %v1658_v33, %v746_v43  ;;  %1671 = vrcp.f32 %v1973_v52  ;;  %v710_v61 = vor.u32 1.1754944e-38, %v709_v47 }
  0x3c   : > { %1673 = vpow2.f32 %v312_v56 }
  0x3d   : > { %v751_v60 = vsel %vm1975_vm2, %v1658_v33, %v747_v50  ;;  %1675 = vpow2.f32 %v316_v4  ;;  %v740_v4 = vor.u32 1.1754944e-38, %v739_v53 }
  0x3e   : > { %v1984_v57 = vpop.eup %1665  ;;  %v756_v2 = vsel %vm753_vm3, %v755_v58, %v751_v60  ;;  %1677 = vpow2.f32 %v314_v18  ;;  %v737_v58 = vand.u32 2147483647, %v1969_v46 }
  0x3f   : > { %v699_v63 = vmul.f32 %v1984_v57, %v1957_v40  ;;  %v1668_v0 = vpop.eup %1667  ;;  %v789_v9 = vmul.f32 %v1940_v24, %v756_v2  ;;  %vm704_vm9 = vweird.f32 %v1984_v57 }
  0x40   : > { %v1995_v5 = vpop.eup %1669  ;;  %v479_v10 = vmul.f32 0.6931472, %v1668_v0  ;;  %vm2043_vm10 = vmor %vm703_vm8, %vm704_vm9  ;;  %v471_v0 = vmul.f32 -0.5, %v1960_v42  ;;  %vm738_vm2 = vcmp.eq.f32.partialorder %v737_v58, 8.507059e+37  ;;  %vm771_vm9 = vcmp.ge.f32.partialorder %v1947_v28, 0.0 }
  0x41   : > { %v1997_v8 = vpop.eup %1671  ;;  %v700_v12 = vsub.f32 1.0, %v699_v63  ;;  %v729_v14 = vmul.f32 %v1995_v5, %v1969_v46  ;;  %v2015_v22 = vsel %vm773_vm4, %v756_v2, %v789_v9  ;;  %vm734_vm12 = vweird.f32 %v1995_v5 }
  0x42   : > { %v2008_v15 = vpop.eup %1673  ;;  %v714_v20 = vmul.f32 %v1997_v8, %v1973_v52  ;;  %v485_v23 = vsel %vm2002_vm5, %v482_v11, %v479_v10  ;;  %vm719_vm15 = vweird.f32 %v1997_v8  ;;  %vm2075_vm0 = vmor %vm733_vm11, %vm734_vm12  ;;  %v462_v10 = vmul.f32 -0.5, %v1965_v45 }
  0x43   : > { %856 = vperm.xlu0 %1652, %v235_v16   ;;  %v2010_v16 = vand.u32 127, %v838_v6  ;;  %v701_v24 = vmul.f32 %v1984_v57, %v700_v12  ;;  %v730_v26 = vsub.f32 1.0, %v729_v14  ;;  %v2021_v29 = vadd.f32 1.0, %v2008_v15  ;;  %v2026_v30 = vpop.eup %1675  ;;  %vm2089_vm1 = vmor %vm718_vm14, %vm719_vm15 }
  0x44   : > { %v2034_v33 = vadd.f32 %v485_v23, %v341_v19  ;;  %v715_v34 = vsub.f32 1.0, %v714_v20  ;;  %v2050_v48 = vadd.f32 1.0, %v2026_v30  ;;  %v2059_v51 = vpop.eup %1677  ;;  %v456_v14 = vand.u32 2147483647, %v1951_v37 }
  0x45   : > { %v702_v39 = vadd.f32 %v1984_v57, %v701_v24  ;;  %v731_v43 = vmul.f32 %v1995_v5, %v730_v26  ;;  %1679 = vrcp.f32 %v2021_v29  ;;  %v2087_v2 = vadd.f32 1.0, %v2059_v51 }
  0x46   : > { %1681 = vlog2.f32 %v1957_v40  ;;  %v716_v50 = vmul.f32 %v1997_v8, %v715_v34  ;;  %v472_v18 = vadd.f32 1.0, %v471_v0  ;;  %v474_v20 = vand.u32 2147483647, %v1960_v42 }
  0x47   : > { %1683 = vlog2.f32 %v1969_v46  ;;  %v706_v40 = vsel %vm2043_vm10, %v1984_v57, %v702_v39  ;;  %v732_v56 = vadd.f32 %v1995_v5, %v731_v43  ;;  %v724_v57 = vand.u32 2147483648, %v1973_v52 }
  0x48   : > { %1685 = vrcp.f32 %v2050_v48  ;;  %v717_v63 = vadd.f32 %v1997_v8, %v716_v50  ;;  %v722_v46 = vand.u32 2147483647, %v1973_v52  ;;  %v711_v13 = vsel %vm2066_vm13, %v710_v61, %v706_v40 }
  0x49   : > { %1687 = vlog2.f32 %v1973_v52  ;;  %v736_v9 = vsel %vm2075_vm0, %v1995_v5, %v732_v56  ;;  %v725_v12 = vor.u32 1.1754944e-38, %v724_v57  ;;  %v454_v23 = vadd.f32 1.0, %v453_v7  ;;  %v2148_v57 = vld [vmem:[%s1930_s4 + $0x40] sm:$0xff] }
  0x4a   : > { %v721_v52 = vsel %vm2089_vm1, %v1997_v8, %v717_v63  ;;  %vm723_vm3 = vcmp.eq.f32.partialorder %v722_v46, 8.507059e+37  ;;  %1689 = vrcp.f32 %v2087_v2  ;;  %v741_v5 = vsel %vm738_vm2, %v740_v4, %v736_v9 }
  0x4b   : > { %v2081_v62 = vpop.eup %1679  ;;  %vm770_vm4 = vcmp.ge.f32.partialorder %v1937_v21, 0.0  ;;  %v338_v26 = vmax.f32 %v1937_v21, 0.0  ;;  %v726_v8 = vsel %vm723_vm3, %v725_v12, %v721_v52  ;;  %v786_v34 = vmul.f32 %v1951_v37, %v711_v13 }
  0x4c   : > { %v1682_v3 = vpop.eup %1681  ;;  %vm2117_vm5 = vcmp.lt.f32.partialorder %v456_v14, 0.0004427343  ;;  %v788_v39 = vmul.f32 %v1960_v42, %v741_v5  ;;  %v473_v43 = vmul.f32 %v1960_v42, %v472_v18  ;;  %vm2126_vm8 = vcmp.lt.f32.partialorder %v474_v20, 0.0004427343 }
  0x4d   : > { %v1684_v11 = vpop.eup %1683  ;;  %v455_v50 = vmul.f32 %v1951_v37, %v454_v23  ;;  %v787_v40 = vmul.f32 %v1965_v45, %v726_v8  ;;  %v654_v56 = vmul.f32 %v2081_v62, %v2021_v29  ;;  %v2141_v60 = vsel %vm770_vm4, %v711_v13, %v786_v34 }
  0x4e   : > { %v2106_v19 = vpop.eup %1685  ;;  %v470_v41 = vmul.f32 0.6931472, %v1684_v11  ;;  %v339_v46 = vmax.f32 %v1947_v28, 0.0  ;;  %v692_v0 = vand.u32 2147483647, %v2050_v48  ;;  %vm688_vm12 = vweird.f32 %v2050_v48 }
  0x4f   : > { %v2165_v7 = vsel %vm771_vm9, %v726_v8, %v787_v40  ;;  %v270_v11 = vand.u32 2147483647, %v2148_v57  ;;  %v655_v52 = vsub.f32 1.0, %v654_v56  ;;  %v337_v23 = vmax.f32 %v1963_v44, 0.0 }
  0x50   : > { %v476_v61 = vsel %vm2126_vm8, %v473_v43, %v470_v41  ;;  %vm2188_vm13 = vcmp.eq.f32.partialorder %v692_v0, 8.507059e+37  ;;  %1691 = vlog2.f32 %v2050_v48  ;;  %vm689_vm14 = vweird.f32 %v2106_v19 }
  0x51   : > { %v286_v34 = vsub.f32 0.0, %v270_v11  ;;  %vm673_vm15 = vweird.f32 %v2087_v2  ;;  %v656_v41 = vmul.f32 %v2081_v62, %v655_v52  ;;  %vm658_vm0 = vweird.f32 %v2021_v29  ;;  %vm2216_vm1 = vmor %vm688_vm12, %vm689_vm14 }
  0x52   : > { %vm659_vm2 = vweird.f32 %v2081_v62  ;;  %vm769_vm8 = vcmp.ge.f32.partialorder %v1963_v44, 0.0 }
  0x53   : > { %v310_v43 = vmul.f32 1.442695, %v286_v34  ;;  %vm2250_vm9 = vmor %vm658_vm0, %vm659_vm2  ;;  %v2273_v34 = vld [vmem:[%s1930_s4 + $0x30] sm:$0xff] }
  0x55   : > { %1693 = vpow2.f32 %v310_v43 }
  0x56   : > { %1695 = vlog2.f32 %v2087_v2 }
  0x57   : > { %1697 = vlog2.f32 %v2021_v29 }
  0x74   : > { %v1992_v1 = vpop.permute.xlu2 %853 }
  0x7c   : > { %v887_v25 = vpop.permute.xlu2 %886 }
  0x7d   : > { %vm903_vm7 = vcmp.eq.s32.totalorder %v2010_v16, %v887_v25  ;;  %v463_v25 = vadd.f32 1.0, %v462_v10  ;;  %v694_v10 = vand.u32 2147483648, %v2050_v48 }
  0x7e   : > { %v919_v31 = vsel %vm903_vm7, %v1933_v17, 0.0  ;;  %v984_v32 = vsel %vm903_vm7, %v2015_v22, 0.0  ;;  %v1048_v49 = vsel %vm903_vm7, %v2034_v33, 0.0  ;;  %v684_v17 = vmul.f32 %v2106_v19, %v2050_v48 }
  0x7f   : > { %v966_v35 = vsel %vm920_vm6, %v919_v31, 0.0  ;;  %v1030_v36 = vsel %vm920_vm6, %v984_v32, 0.0  ;;  %v1094_v59 = vsel %vm920_vm6, %v1048_v49, 0.0  ;;  %v1688_v31 = vpop.eup %1687  ;;  %vm772_vm7 = vcmp.ge.f32.partialorder %v1944_v27, 0.0 }
  0x80   : > { %967 = vadd.xlane.f32.xlu2 %v966_v35  ;;  %1031 = vadd.xlane.f32.xlu1 %v1030_v36  ;;  %v465_v35 = vand.u32 2147483647, %v1965_v45  ;;  %v452_v49 = vmul.f32 0.6931472, %v1682_v3  ;;  %v2131_v53 = vpop.eup %1689  ;;  %v461_v55 = vmul.f32 0.6931472, %v1688_v31  ;;  %v464_v42 = vmul.f32 %v1965_v45, %v463_v25 }
  0x81   : > { %v2153_v45 = vsel %vm772_vm7, %v741_v5, %v788_v39  ;;  %v685_v63 = vsub.f32 1.0, %v684_v17  ;;  %v669_v4 = vmul.f32 %v2131_v53, %v2087_v2  ;;  %v2199_v36 = vld [vmem:[%s1930_s4 + $0x38] sm:$0xff]  ;;  %v447_v48 = vand.u32 2147483647, %v2026_v30  ;;  %v1692_v37 = vpop.eup %1691 }
  0x82   : > { %vm2143_vm10 = vcmp.lt.f32.partialorder %v465_v35, 0.0004427343  ;;  %v458_v3 = vsel %vm2117_vm5, %v455_v50, %v452_v49  ;;  %v679_v49 = vand.u32 2147483648, %v2087_v2  ;;  %vm674_vm5 = vweird.f32 %v2131_v53 }
  0x83   : > { %v467_v9 = vsel %vm2143_vm10, %v464_v42, %v461_v55  ;;  %v686_v5 = vmul.f32 %v2106_v19, %v685_v63  ;;  %v2183_v20 = vadd.f32 %v458_v3, %v338_v26  ;;  %v670_v8 = vsub.f32 1.0, %v669_v4  ;;  %vm2268_vm10 = vmor %vm673_vm15, %vm674_vm5 }
  0x84   : > { %v878_v58 = vpop.permute.xlu2 %877  ;;  %v2186_v25 = vadd.f32 %v467_v9, %v339_v46  ;;  %v677_v26 = vand.u32 2147483647, %v2087_v2  ;;  %v269_v55 = vand.u32 2147483647, %v2199_v36  ;;  %v657_v63 = vadd.f32 %v2081_v62, %v656_v41 }
  0x85   : > { %vm900_vm11 = vcmp.eq.s32.totalorder %v2010_v16, %v878_v58  ;;  %v687_v17 = vadd.f32 %v2106_v19, %v686_v5  ;;  %v671_v40 = vmul.f32 %v2131_v53, %v670_v8  ;;  %v444_v58 = vmul.f32 -0.5, %v2026_v30 }
  0x86   : > { %v981_v14 = vsel %vm900_vm11, %v2141_v60, 0.0  ;;  %v916_v18 = vsel %vm900_vm11, %v1937_v21, 0.0  ;;  %v695_v21 = vor.u32 1.1754944e-38, %v694_v10  ;;  %v2210_v47 = vsel %vm900_vm11, %v2183_v20, 0.0 }
  0x87   : > { %v2194_v35 = vsel %vm920_vm6, %v981_v14, 0.0  ;;  %v2202_v39 = vsel %vm920_vm6, %v916_v18, 0.0  ;;  %vm2225_vm3 = vcmp.eq.f32.partialorder %v677_v26, 8.507059e+37  ;;  %v662_v46 = vand.u32 2147483647, %v2021_v29  ;;  %v2275_v26 = vpop.eup %1693 }
  0x88   : > { %1095 = vadd.xlane.f32.xlu2 %v1094_v59  ;;  %v340_v59 = vmax.f32 %v1944_v27, 0.0  ;;  %v691_v3 = vsel %vm2216_vm1, %v2106_v19, %v687_v17  ;;  %v285_v9 = vsub.f32 0.0, %v269_v55  ;;  %v672_v14 = vadd.f32 %v2131_v53, %v671_v40 }
  0x89   : > { %v680_v41 = vor.u32 1.1754944e-38, %v679_v49  ;;  %v2277_v43 = vmul.f32 0.6931472, %v1692_v37  ;;  %v661_v17 = vsel %vm2250_vm9, %v2081_v62, %v657_v63  ;;  %vm663_vm11 = vcmp.eq.f32.partialorder %v662_v46, 8.507059e+37 }
  0x8a   : > { %v2173_v13 = vadd.f32 %v476_v61, %v340_v59  ;;  %v664_v59 = vand.u32 2147483648, %v2021_v29  ;;  %v696_v50 = vsel %vm2188_vm13, %v695_v21, %v691_v3  ;;  %v2286_v40 = vadd.f32 1.0, %v2275_v26  ;;  %v1696_v3 = vpop.eup %1695 }
  0x8b   : > { %v308_v55 = vmul.f32 1.442695, %v285_v9  ;;  %v676_v49 = vsel %vm2268_vm10, %v2131_v53, %v672_v14  ;;  %v268_v62 = vand.u32 2147483647, %v2273_v34  ;;  %vm2297_vm12 = vcmp.lt.f32.partialorder %v447_v48, 0.0004427343 }
  0x8c   : > { %v2109_v24 = vpop.permute.xlu1 %847  ;;  %v665_v8 = vor.u32 1.1754944e-38, %v664_v59  ;;  %1699 = vrcp.f32 %v2286_v40  ;;  %v785_v21 = vmul.f32 %v2026_v30, %v696_v50  ;;  %v2310_v37 = vpop.permute.xlu2 %868  ;;  %v681_v63 = vsel %vm2225_vm3, %v680_v41, %v676_v49  ;;  %v2342_v14 = vld [vmem:[%s1930_s4 + $0x28] sm:$0xff] }
  0x8d   : > { %v2113_v32 = vpop.permute.xlu0 %841  ;;  %1701 = vpow2.f32 %v308_v55  ;;  %vm768_vm13 = vcmp.ge.f32.partialorder %v1980_v54, 0.0  ;;  %v426_v46 = vmul.f32 -0.5, %v2008_v15  ;;  %vm897_vm14 = vcmp.eq.s32.totalorder %v2010_v16, %v2310_v37 }
  0x8e   : > { %v666_v2 = vsel %vm663_vm11, %v665_v8, %v661_v17  ;;  %vm767_vm15 = vcmp.ge.f32.partialorder %v1954_v38, 0.0  ;;  %v913_v5 = vsel %vm897_vm14, %v1954_v38, 0.0  ;;  %v429_v8 = vand.u32 2147483647, %v2008_v15 }
  0x8f   : > { %v434_v49 = vmul.f32 0.6931472, %v1696_v3  ;;  %vm643_vm3 = vweird.f32 %v2286_v40  ;;  %v647_v3 = vand.u32 2147483647, %v2286_v40 }
  0x90   : > { %vm2381_vm2 = vcmp.lt.f32.partialorder %v429_v8, 0.0004427343 }
  0x91   : > { %vm648_vm10 = vcmp.eq.f32.partialorder %v647_v3, 8.507059e+37 }
  0x94   : > { %v2163_v6 = vpop.permute.xlu1 %850 }
  0x95   : > { %v2171_v12 = vpop.permute.xlu0 %844 }
  0x9c   : > { %v2223_v42 = vpop.permute.xlu1 %880 }
  0x9d   : > { %vm901_vm4 = vcmp.eq.s32.totalorder %v2010_v16, %v2223_v42  ;;  %v884_v61 = vpop.permute.xlu0 %883 }
  0x9e   : > { %vm902_vm7 = vcmp.eq.s32.totalorder %v2010_v16, %v884_v61  ;;  %v982_v0 = vsel %vm901_vm4, %v2165_v7, 0.0  ;;  %v917_v29 = vsel %vm901_vm4, %v1947_v28, 0.0  ;;  %v438_v61 = vand.u32 2147483647, %v2059_v51 }
  0x9f   : > { %v918_v10 = vsel %vm902_vm7, %v1944_v27, 0.0  ;;  %v983_v11 = vsel %vm902_vm7, %v2153_v45, 0.0  ;;  %v1024_v19 = vsel %vm920_vm6, %v982_v0, 0.0  ;;  %v445_v27 = vadd.f32 1.0, %v444_v58 }
  0xa0   : > { %v963_v52 = vsel %vm920_vm6, %v918_v10, 0.0  ;;  %v1027_v18 = vsel %vm920_vm6, %v983_v11, 0.0  ;;  %1025 = vadd.xlane.f32.xlu2 %v1024_v19  ;;  %v435_v58 = vmul.f32 -0.5, %v2059_v51  ;;  %v1047_v53 = vsel %vm902_vm7, %v2173_v13, 0.0  ;;  %v1698_v10 = vpop.eup %1697 }
  0xa1   : > { %964 = vadd.xlane.f32.xlu1 %v963_v52  ;;  %1028 = vadd.xlane.f32.xlu0 %v1027_v18  ;;  %v2295_v59 = vmul.f32 %v2026_v30, %v445_v27  ;;  %v783_v28 = vmul.f32 %v2008_v15, %v666_v2  ;;  %v284_v0 = vsub.f32 0.0, %v268_v62  ;;  %v1091_v4 = vsel %vm920_vm6, %v1047_v53, 0.0  ;;  %v2344_v52 = vpop.eup %1699 }
  0xa2   : > { %v436_v30 = vadd.f32 1.0, %v435_v58  ;;  %v960_v56 = vsel %vm920_vm6, %v917_v29, 0.0  ;;  %v2334_v11 = vsel %vm769_vm8, %v696_v50, %v785_v21  ;;  %v784_v19 = vmul.f32 %v2059_v51, %v681_v63 }
  0xa3   : > { %v449_v9 = vsel %vm2297_vm12, %v2295_v59, %v2277_v43  ;;  %vm2346_vm1 = vcmp.lt.f32.partialorder %v438_v61, 0.0004427343  ;;  %v427_v27 = vadd.f32 1.0, %v426_v46  ;;  %v2357_v41 = vsel %vm767_vm15, %v666_v2, %v783_v28 }
  0xa4   : > { %v437_v43 = vmul.f32 %v2059_v51, %v436_v30  ;;  %v639_v17 = vmul.f32 %v2344_v52, %v2286_v40  ;;  %v306_v50 = vmul.f32 1.442695, %v284_v0  ;;  %v267_v62 = vand.u32 2147483647, %v2342_v14  ;;  %v2370_v59 = vpop.permute.xlu1 %871 }
  0xa5   : > { %v2312_v48 = vpop.permute.xlu0 %874  ;;  %v1046_v51 = vsel %vm901_vm4, %v2186_v25, 0.0  ;;  %v2378_v31 = vsel %vm768_vm13, %v681_v63, %v784_v19  ;;  %v425_v53 = vmul.f32 0.6931472, %v1698_v10  ;;  %v428_v29 = vmul.f32 %v2008_v15, %v427_v27 }
  0xa6   : > { %vm899_vm0 = vcmp.eq.s32.totalorder %v2010_v16, %v2312_v48  ;;  %v640_v2 = vsub.f32 1.0, %v639_v17  ;;  %1703 = vpow2.f32 %v306_v50  ;;  %vm644_vm4 = vweird.f32 %v2344_v52 }
  0xa7   : > { %v980_v55 = vsel %vm899_vm0, %v2334_v11, 0.0  ;;  %vm898_vm5 = vcmp.eq.s32.totalorder %v2010_v16, %v2370_v59  ;;  %v1088_v15 = vsel %vm920_vm6, %v1046_v51, 0.0  ;;  %v649_v63 = vand.u32 2147483648, %v2286_v40  ;;  %vm2418_vm7 = vmor %vm643_vm3, %vm644_vm4 }
  0xa8   : > { %1022 = vadd.xlane.f32.xlu2 %v2194_v35  ;;  %v2338_v35 = vsel %vm920_vm6, %v2210_v47, 0.0  ;;  %v2355_v47 = vpop.eup %1701  ;;  %v1018_v61 = vsel %vm920_vm6, %v980_v55, 0.0  ;;  %v641_v42 = vmul.f32 %v2344_v52, %v640_v2  ;;  %v283_v46 = vsub.f32 0.0, %v267_v62 }
  0xa9   : > { %1092 = vadd.xlane.f32.xlu0 %v1091_v4  ;;  %961 = vadd.xlane.f32.xlu1 %v960_v56  ;;  %v2367_v58 = vadd.f32 1.0, %v2355_v47  ;;  %v2397_v28 = vadd.f32 %v449_v9, %v337_v23  ;;  %v336_v30 = vmax.f32 %v1980_v54, 0.0  ;;  %v2403_v4 = vld [vmem:[%s1930_s4 + $0x20] sm:$0xff]  ;;  %v2405_v56 = vpop.permute.xlu2 %859  ;;  %v978_v10 = vsel %vm897_vm14, %v2357_v41, 0.0 }
  0xaa   : > { %v642_v0 = vadd.f32 %v2344_v52, %v641_v42  ;;  %v335_v9 = vmax.f32 %v1954_v38, 0.0  ;;  %v304_v19 = vmul.f32 1.442695, %v283_v46  ;;  %v979_v8 = vsel %vm898_vm5, %v2378_v31, 0.0 }
  0xab   : > { %1705 = vrcp.f32 %v2367_v58  ;;  %v431_v17 = vsel %vm2381_vm2, %v428_v29, %v425_v53  ;;  %v417_v50 = vmul.f32 -0.5, %v2275_v26  ;;  %v650_v62 = vor.u32 1.1754944e-38, %v649_v63 }
  0xac   : > { %v2423_v27 = vpop.eup %1703  ;;  %vm766_vm8 = vcmp.ge.f32.partialorder %v2148_v57, 0.0  ;;  %1707 = vpow2.f32 %v304_v19  ;;  %v266_v51 = vand.u32 2147483647, %v2403_v4  ;;  %vm894_vm9 = vcmp.eq.s32.totalorder %v2010_v16, %v2405_v56 }
  0xad   : > { %v2438_v38 = vadd.f32 1.0, %v2423_v27  ;;  %v915_v18 = vsel %vm899_vm0, %v1963_v44, 0.0  ;;  %v1012_v2 = vsel %vm920_vm6, %v978_v10, 0.0  ;;  %v2455_v29 = vadd.f32 %v431_v17, %v335_v9  ;;  %v2485_v23 = vpop.permute.xlu0 %865  ;;  %v2598_v44 = vld [vmem:[%s1930_s4 + $0x10] sm:$0xff] }
  0xae   : > { %v1015_v21 = vsel %vm920_vm6, %v979_v8, 0.0  ;;  %v418_v42 = vadd.f32 1.0, %v417_v50  ;;  %v282_v46 = vsub.f32 0.0, %v266_v51  ;;  %vm628_vm11 = vweird.f32 %v2367_v58 }
  0xaf   : > { %3318 = vst [vmem:[#allocation5_spill] sm:$0xff] %v2455_v29  ;;  %1709 = vrcp.f32 %v2438_v38  ;;  %v632_v48 = vand.u32 2147483647, %v2367_v58  ;;  %v634_v10 = vand.u32 2147483648, %v2367_v58  ;;  %v420_v50 = vand.u32 2147483647, %v2275_v26 }
  0xb0   : > { %1019 = vadd.xlane.f32.xlu2 %v1018_v61  ;;  %1711 = vlog2.f32 %v2286_v40  ;;  %vm613_vm2 = vweird.f32 %v2438_v38  ;;  %v399_v17 = vmul.f32 -0.5, %v2423_v27 }
  0xb1   : > { %1089 = vadd.xlane.f32.xlu0 %v1088_v15  ;;  %958 = vadd.xlane.f32.xlu1 %v2202_v39  ;;  %v2412_v39 = vsel %vm920_vm6, %v913_v5, 0.0  ;;  %v440_v5 = vsel %vm2346_vm1, %v437_v43, %v434_v49  ;;  %v2434_v55 = vpop.eup %1705  ;;  %v646_v43 = vsel %vm2418_vm7, %v2344_v52, %v642_v0  ;;  %v954_v52 = vsel %vm920_vm6, %v915_v18, 0.0 }
  0xb2   : > { %v624_v49 = vmul.f32 %v2434_v55, %v2367_v58  ;;  %v2453_v53 = vadd.f32 %v440_v5, %v336_v30  ;;  %v914_v15 = vsel %vm898_vm5, %v1980_v54, 0.0  ;;  %v651_v63 = vsel %vm648_vm10, %v650_v62, %v646_v43  ;;  %v2473_v3 = vpop.eup %1707  ;;  %v2513_v43 = vpop.permute.xlu1 %862 }
  0xb3   : > { %v1044_v30 = vsel %vm899_vm0, %v2397_v28, 0.0  ;;  %vm629_vm12 = vweird.f32 %v2434_v55  ;;  %v782_v9 = vmul.f32 %v2275_v26, %v651_v63  ;;  %v2491_v59 = vadd.f32 1.0, %v2473_v3 }
  0xb4   : > { %v625_v61 = vsub.f32 1.0, %v624_v49  ;;  %v1043_v54 = vsel %vm898_vm5, %v2453_v53, 0.0  ;;  %v1082_v37 = vsel %vm920_vm6, %v1044_v30, 0.0  ;;  %v951_v5 = vsel %vm920_vm6, %v914_v15, 0.0  ;;  %vm2499_vm13 = vmor %vm628_vm11, %vm629_vm12 }
  0xb5   : > { %v2493_v8 = vpop.eup %1709  ;;  %v302_v62 = vmul.f32 1.442695, %v282_v46  ;;  %v2505_v40 = vsel %vm920_vm6, %v1043_v54, 0.0  ;;  %1713 = vrcp.f32 %v2491_v59  ;;  %vm2517_vm15 = vcmp.eq.f32.partialorder %v632_v48, 8.507059e+37 }
  0xb6   : > { %v626_v0 = vmul.f32 %v2434_v55, %v625_v61  ;;  %v609_v18 = vmul.f32 %v2493_v8, %v2438_v38  ;;  %vm765_vm0 = vcmp.ge.f32.partialorder %v2199_v36, 0.0  ;;  %v2523_v61 = vmul.f32 %v2275_v26, %v418_v42 }
  0xb7   : > { %v2530_v15 = vsel %vm766_vm8, %v651_v63, %v782_v9  ;;  %1715 = vpow2.f32 %v302_v62  ;;  %vm2535_vm1 = vcmp.lt.f32.partialorder %v420_v50, 0.0004427343  ;;  %vm614_vm3 = vweird.f32 %v2493_v8  ;;  %v1712_v63 = vpop.eup %1711 }
  0xb8   : > { %1016 = vadd.xlane.f32.xlu2 %v1015_v21  ;;  %v627_v19 = vadd.f32 %v2434_v55, %v626_v0  ;;  %v635_v21 = vor.u32 1.1754944e-38, %v634_v10  ;;  %3323 = vst [vmem:[#allocation6_spill] sm:$0xff] %v2530_v15  ;;  %v610_v30 = vsub.f32 1.0, %v609_v18  ;;  %v910_v26 = vsel %vm894_vm9, %v2273_v34, 0.0  ;;  %vm2566_vm5 = vmor %vm613_vm2, %vm614_vm3 }
  0xb9   : > { %1086 = vadd.xlane.f32.xlu0 %v2338_v35  ;;  %955 = vadd.xlane.f32.xlu1 %v954_v52  ;;  %v1042_v35 = vsel %vm897_vm14, %v2455_v29, 0.0  ;;  %vm896_vm14 = vcmp.eq.s32.totalorder %v2010_v16, %v2485_v23  ;;  %v2526_v52 = vld [vmem:[%s1930_s4 + $0x18] sm:$0xff]  ;;  %vm895_vm4 = vcmp.eq.s32.totalorder %v2010_v16, %v2513_v43  ;;  %v617_v10 = vand.u32 2147483647, %v2438_v38 }
  0xba   : > { %v2508_v51 = vsel %vm920_vm6, %v1042_v35, 0.0  ;;  %v631_v46 = vsel %vm2499_vm13, %v2434_v55, %v627_v19  ;;  %v611_v55 = vmul.f32 %v2493_v8, %v610_v30  ;;  %v265_v54 = vand.u32 2147483647, %v2526_v52 }
  0xbb   : > { %v977_v35 = vsel %vm896_vm14, %v2530_v15, 0.0  ;;  %v636_v48 = vsel %vm2517_vm15, %v635_v21, %v631_v46  ;;  %1717 = vlog2.f32 %v2367_v58  ;;  %v2559_v9 = vpop.eup %1713  ;;  %v912_v58 = vsel %vm896_vm14, %v2148_v57, 0.0 }
  0xbc   : > { %v612_v19 = vadd.f32 %v2493_v8, %v611_v55  ;;  %1719 = vlog2.f32 %v2438_v38  ;;  %v416_v50 = vmul.f32 0.6931472, %v1712_v63  ;;  %v2578_v62 = vsel %vm920_vm6, %v910_v26, 0.0 }
  0xbd   : > { %v594_v18 = vmul.f32 %v2559_v9, %v2491_v59  ;;  %v2582_v49 = vpop.eup %1715  ;;  %v1009_v21 = vsel %vm920_vm6, %v977_v35, 0.0  ;;  %vm764_vm7 = vcmp.ge.f32.partialorder %v2273_v34, 0.0  ;;  %v281_v30 = vsub.f32 0.0, %v265_v54 }
  0xbe   : > { %v616_v63 = vsel %vm2566_vm5, %v2493_v8, %v612_v19  ;;  %vm2590_vm8 = vcmp.eq.f32.partialorder %v617_v10, 8.507059e+37  ;;  %v2595_v42 = vadd.f32 1.0, %v2582_v49  ;;  %v400_v29 = vadd.f32 1.0, %v399_v17 }
  0xbf   : > { %v595_v55 = vsub.f32 1.0, %v594_v18  ;;  %v402_v54 = vand.u32 2147483647, %v2423_v27  ;;  %vm598_vm10 = vweird.f32 %v2491_v59  ;;  %vm599_vm11 = vweird.f32 %v2559_v9 }
  0xc0   : > { %1013 = vadd.xlane.f32.xlu2 %v1012_v2  ;;  %v619_v2 = vand.u32 2147483648, %v2438_v38  ;;  %v781_v38 = vmul.f32 %v2355_v47, %v636_v48  ;;  %1721 = vrcp.f32 %v2595_v42  ;;  %v300_v17 = vmul.f32 1.442695, %v281_v30  ;;  %vm2634_vm13 = vmor %vm598_vm10, %vm599_vm11 }
  0xc1   : > { %1083 = vadd.xlane.f32.xlu0 %v1082_v37  ;;  %952 = vadd.xlane.f32.xlu1 %v951_v5  ;;  %v408_v5 = vmul.f32 -0.5, %v2355_v47  ;;  %v1718_v15 = vpop.eup %1717  ;;  %v596_v8 = vmul.f32 %v2559_v9, %v595_v55  ;;  %v911_v18 = vsel %vm895_vm4, %v2199_v36, 0.0  ;;  %v401_v0 = vmul.f32 %v2423_v27, %v400_v29 }
  0xc2   : > { %v620_v46 = vor.u32 1.1754944e-38, %v619_v2  ;;  %v411_v2 = vand.u32 2147483647, %v2355_v47  ;;  %v1720_v10 = vpop.eup %1719  ;;  %v2610_v19 = vsel %vm765_vm0, %v636_v48, %v781_v38  ;;  %v422_v48 = vsel %vm2535_vm1, %v2523_v61, %v416_v50 }
  0xc3   : > { %v409_v35 = vadd.f32 1.0, %v408_v5  ;;  %3330 = vst [vmem:[#allocation7_spill] sm:$0xff] %v2610_v19  ;;  %v604_v5 = vand.u32 2147483648, %v2491_v59  ;;  %v407_v38 = vmul.f32 0.6931472, %v1718_v15  ;;  %v976_v61 = vsel %vm895_vm4, %v2610_v19, 0.0 }
  0xc4   : > { %v621_v37 = vsel %vm2590_vm8, %v620_v46, %v616_v63  ;;  %vm2626_vm12 = vcmp.lt.f32.partialorder %v411_v2, 0.0004427343  ;;  %v945_v50 = vsel %vm920_vm6, %v912_v58, 0.0  ;;  %vm2645_vm15 = vcmp.lt.f32.partialorder %v402_v54, 0.0004427343 }
  0xc5   : > { %v410_v46 = vmul.f32 %v2355_v47, %v409_v35  ;;  %v780_v15 = vmul.f32 %v2423_v27, %v621_v37  ;;  %v398_v47 = vmul.f32 0.6931472, %v1720_v10  ;;  %v605_v26 = vor.u32 1.1754944e-38, %v604_v5  ;;  %v2653_v10 = vpop.permute.xlu0 %856 }
  0xc6   : > { %1723 = vpow2.f32 %v300_v17  ;;  %v1722_v35 = vpop.eup %1721  ;;  %v333_v2 = vmax.f32 %v2199_v36, 0.0  ;;  %v1006_v27 = vsel %vm920_vm6, %v976_v61, 0.0  ;;  %v3337_v29 = vmax.f32 %v2148_v57, 0.0 }
  0xc7   : > { %v413_v54 = vsel %vm2626_vm12, %v410_v46, %v407_v38  ;;  %v579_v5 = vmul.f32 %v1722_v35, %v2595_v42  ;;  %v942_v36 = vsel %vm920_vm6, %v911_v18, 0.0  ;;  %v404_v17 = vsel %vm2645_vm15, %v401_v0, %v398_v47  ;;  %v2706_v47 = vld [vmem:[%s1930_s4] sm:$0xff] }
  0xc8   : > { %1010 = vadd.xlane.f32.xlu2 %v1009_v21  ;;  %v597_v21 = vadd.f32 %v2559_v9, %v596_v8  ;;  %v2658_v58 = vadd.f32 %v422_v48, %v3337_v29  ;;  %vm583_vm1 = vweird.f32 %v2595_v42  ;;  %vm584_vm2 = vweird.f32 %v1722_v35 }
  0xc9   : > { %1080 = vadd.xlane.f32.xlu0 %v2505_v40  ;;  %949 = vadd.xlane.f32.xlu1 %v2412_v39  ;;  %v602_v40 = vand.u32 2147483647, %v2491_v59  ;;  %v264_v39 = vand.u32 2147483647, %v2598_v44  ;;  %vm893_vm3 = vcmp.eq.s32.totalorder %v2010_v16, %v2653_v10  ;;  %v2675_v18 = vadd.f32 %v413_v54, %v333_v2  ;;  %vm2696_vm5 = vmor %vm583_vm1, %vm584_vm2 }
  0xca   : > { %v601_v8 = vsel %vm2634_vm13, %v2559_v9, %v597_v21  ;;  %v2666_v9 = vsel %vm764_vm7, %v621_v37, %v780_v15  ;;  %v580_v21 = vsub.f32 1.0, %v579_v5  ;;  %v587_v37 = vand.u32 2147483647, %v2595_v42 }
  0xcb   : > { %vm603_vm0 = vcmp.eq.f32.partialorder %v602_v40, 8.507059e+37  ;;  %v280_v19 = vsub.f32 0.0, %v264_v39  ;;  %v589_v40 = vand.u32 2147483648, %v2595_v42  ;;  %v3338_v38 = vmax.f32 %v2273_v34, 0.0 }
  0xcc   : > { %v606_v57 = vsel %vm603_vm0, %v605_v26, %v601_v8  ;;  %v2678_v48 = vpop.eup %1723  ;;  %v581_v30 = vmul.f32 %v1722_v35, %v580_v21  ;;  %1725 = vlog2.f32 %v2491_v59  ;;  %v975_v63 = vsel %vm894_vm9, %v2666_v9, 0.0 }
  0xcd   : > { %v298_v39 = vmul.f32 1.442695, %v280_v19  ;;  %v2686_v46 = vadd.f32 %v404_v17, %v3338_v38  ;;  %v779_v19 = vmul.f32 %v2473_v3, %v606_v57  ;;  %v2701_v34 = vadd.f32 1.0, %v2678_v48 }
  0xce   : > { %v582_v23 = vadd.f32 %v1722_v35, %v581_v30  ;;  %v590_v59 = vor.u32 1.1754944e-38, %v589_v40  ;;  %v390_v15 = vmul.f32 -0.5, %v2473_v3  ;;  %v1040_v0 = vsel %vm895_vm4, %v2675_v18, 0.0 }
  0xcf   : > { %3339 = vst [vmem:[#allocation8_spill] sm:$0xff] %v2686_v46  ;;  %1727 = vpow2.f32 %v298_v39  ;;  %vm2712_vm7 = vcmp.eq.f32.partialorder %v587_v37, 8.507059e+37  ;;  %v381_v26 = vmul.f32 -0.5, %v2582_v49  ;;  %vm888_vm8 = vcmp.eq.s32.totalorder %v2010_v16, %v2113_v32 }
  0xd0   : > { %1007 = vadd.xlane.f32.xlu2 %v1006_v27  ;;  %1729 = vrcp.f32 %v2701_v34  ;;  %v1003_v55 = vsel %vm920_vm6, %v975_v63, 0.0  ;;  %v1039_v2 = vsel %vm894_vm9, %v2686_v46, 0.0  ;;  %v909_v43 = vsel %vm893_vm3, %v2342_v14, 0.0 }
  0xd1   : > { %1077 = vadd.xlane.f32.xlu0 %v2508_v51  ;;  %946 = vadd.xlane.f32.xlu1 %v945_v50  ;;  %v1041_v51 = vsel %vm896_vm14, %v2658_v58, 0.0  ;;  %vm763_vm14 = vcmp.ge.f32.partialorder %v2342_v14, 0.0  ;;  %v586_v8 = vsel %vm2696_vm5, %v1722_v35, %v582_v23  ;;  %vm892_vm4 = vcmp.eq.s32.totalorder %v2010_v16, %v1992_v1 }
  0xd2   : > { %v1073_v27 = vsel %vm920_vm6, %v1041_v51, 0.0  ;;  %v2736_v29 = vsel %vm763_vm14, %v606_v57, %v779_v19  ;;  %v393_v56 = vand.u32 2147483647, %v2473_v3  ;;  %v262_v54 = vand.u32 2147483647, %v2706_v47  ;;  %v1726_v5 = vpop.eup %1725 }
  0xd3   : > { %v591_v35 = vsel %vm2712_vm7, %v590_v59, %v586_v8  ;;  %vm762_vm9 = vcmp.ge.f32.partialorder %v2403_v4, 0.0  ;;  %v391_v17 = vadd.f32 1.0, %v390_v15  ;;  %v1070_v57 = vsel %vm920_vm6, %v1040_v0, 0.0 }
  0xd4   : > { %v2748_v37 = vsel %vm920_vm6, %v1039_v2, 0.0  ;;  %v2751_v39 = vsel %vm920_vm6, %v909_v43, 0.0  ;;  %v974_v51 = vsel %vm893_vm3, %v2736_v29, 0.0  ;;  %1731 = vlog2.f32 %v2595_v42  ;;  %v2779_v2 = vld [vmem:[%s1930_s4 + $0x8] sm:$0xff] }
  0xd5   : > { %v2744_v40 = vpop.eup %1727  ;;  %v382_v38 = vadd.f32 1.0, %v381_v26  ;;  %v778_v19 = vmul.f32 %v2582_v49, %v591_v35  ;;  %vm2763_vm10 = vcmp.lt.f32.partialorder %v393_v56, 0.0004427343  ;;  %v278_v23 = vsub.f32 0.0, %v262_v54 }
  0xd6   : > { %v2760_v30 = vadd.f32 1.0, %v2744_v40  ;;  %v1730_v63 = vpop.eup %1729  ;;  %v389_v59 = vmul.f32 0.6931472, %v1726_v5  ;;  %v392_v15 = vmul.f32 %v2473_v3, %v391_v17  ;;  %v1000_v0 = vsel %vm920_vm6, %v974_v51, 0.0 }
  0xd7   : > { %v564_v42 = vmul.f32 %v1730_v63, %v2701_v34  ;;  %vm568_vm11 = vweird.f32 %v2701_v34  ;;  %v574_v50 = vand.u32 2147483648, %v2701_v34  ;;  %vm761_vm12 = vcmp.ge.f32.partialorder %v2526_v52, 0.0 }
  0xd8   : > { %1004 = vadd.xlane.f32.xlu2 %v1003_v55  ;;  %1733 = vlog2.f32 %v2760_v30  ;;  %vm569_vm13 = vweird.f32 %v1730_v63  ;;  %v572_v55 = vand.u32 2147483647, %v2701_v34  ;;  %v363_v3 = vmul.f32 -0.5, %v2744_v40 }
  0xd9   : > { %1074 = vadd.xlane.f32.xlu0 %v1073_v27  ;;  %943 = vadd.xlane.f32.xlu1 %v942_v36  ;;  %v331_v36 = vmax.f32 %v2342_v14, 0.0  ;;  %v384_v14 = vand.u32 2147483647, %v2582_v49  ;;  %1735 = vrcp.f32 %v2760_v30  ;;  %v565_v26 = vsub.f32 1.0, %v564_v42  ;;  %vm2802_vm1 = vmor %vm568_vm11, %vm569_vm13 }
  0xda   : > { %v2783_v43 = vsel %vm762_vm9, %v591_v35, %v778_v19  ;;  %v2786_v8 = vmul.f32 %v2582_v49, %v382_v38  ;;  %v294_v56 = vmul.f32 1.442695, %v278_v23  ;;  %v1732_v54 = vpop.eup %1731  ;;  %vm891_vm0 = vcmp.eq.s32.totalorder %v2010_v16, %v2163_v6 }
  0xdb   : > { %3346 = vst [vmem:[#allocation9_spill] sm:$0xff] %v2783_v43  ;;  %vm2788_vm15 = vcmp.lt.f32.partialorder %v384_v14, 0.0004427343  ;;  %v395_v5 = vsel %vm2763_vm10, %v392_v15, %v389_v59  ;;  %v566_v35 = vmul.f32 %v1730_v63, %v565_v26  ;;  %1737 = vlog2.f32 %v2701_v34 }
  0xdc   : > { %v372_v49 = vmul.f32 -0.5, %v2678_v48  ;;  %v575_v51 = vor.u32 1.1754944e-38, %v574_v50  ;;  %1739 = vpow2.f32 %v294_v56  ;;  %v973_v34 = vsel %vm892_vm4, %v2783_v43, 0.0 }
  0xdd   : > { %v567_v19 = vadd.f32 %v1730_v63, %v566_v35  ;;  %vm573_vm2 = vcmp.eq.f32.partialorder %v572_v55, 8.507059e+37  ;;  %v364_v61 = vadd.f32 1.0, %v363_v3  ;;  %v380_v23 = vmul.f32 0.6931472, %v1732_v54 }
  0xde   : > { %v1734_v38 = vpop.eup %1733  ;;  %v328_v59 = vmax.f32 %v2598_v44, 0.0  ;;  %v366_v15 = vand.u32 2147483647, %v2744_v40  ;;  %v375_v26 = vand.u32 2147483647, %v2678_v48  ;;  %v997_v55 = vsel %vm920_vm6, %v973_v34, 0.0 }
  0xdf   : > { %v2817_v14 = vpop.eup %1735  ;;  %v571_v50 = vsel %vm2802_vm1, %v1730_v63, %v567_v19  ;;  %v373_v35 = vadd.f32 1.0, %v372_v49  ;;  %v362_v46 = vmul.f32 0.6931472, %v1734_v38  ;;  %v386_v63 = vsel %vm2788_vm15, %v2786_v8, %v380_v23 }
  0xe0   : > { %1001 = vadd.xlane.f32.xlu2 %v1000_v0  ;;  %v2821_v0 = vadd.f32 %v395_v5, %v331_v36  ;;  %v549_v56 = vmul.f32 %v2817_v14, %v2760_v30  ;;  %v576_v3 = vsel %vm573_vm2, %v575_v51, %v571_v50  ;;  %v365_v36 = vmul.f32 %v2744_v40, %v364_v61 }
  0xe1   : > { %1071 = vadd.xlane.f32.xlu0 %v1070_v57  ;;  %940 = vadd.xlane.f32.xlu1 %v2578_v62  ;;  %v263_v57 = vand.u32 2147483647, %v2779_v2  ;;  %v2811_v62 = vsel %vm888_vm8, %v2706_v47, 0.0  ;;  %v1738_v21 = vpop.eup %1737  ;;  %v777_v43 = vmul.f32 %v2678_v48, %v576_v3  ;;  %vm2836_vm5 = vcmp.lt.f32.partialorder %v366_v15, 0.0004427343 }
  0xe2   : > { %v550_v5 = vsub.f32 1.0, %v549_v56  ;;  %vm553_vm14 = vweird.f32 %v2760_v30  ;;  %vm554_vm7 = vweird.f32 %v2817_v14  ;;  %v371_v27 = vmul.f32 0.6931472, %v1738_v21 }
  0xe3   : > { %v279_v42 = vsub.f32 0.0, %v263_v57  ;;  %v2831_v57 = vpop.eup %1739  ;;  %v2845_v49 = vsel %vm761_vm12, %v576_v3, %v777_v43  ;;  %v374_v38 = vmul.f32 %v2678_v48, %v373_v35  ;;  %vm2853_vm9 = vcmp.lt.f32.partialorder %v375_v26, 0.0004427343  ;;  %vm2871_vm11 = vmor %vm553_vm14, %vm554_vm7 }
  0xe4   : > { %v551_v51 = vmul.f32 %v2817_v14, %v550_v5  ;;  %v2850_v8 = vadd.f32 1.0, %v2831_v57  ;;  %v557_v19 = vand.u32 2147483647, %v2760_v30  ;;  %vm890_vm10 = vcmp.eq.s32.totalorder %v2010_v16, %v2109_v24  ;;  %v1751_v24 = vld [vmem:[%s1908_s28 + $0x78] sm:$0xff] }
  0xe5   : > { %v296_v54 = vmul.f32 1.442695, %v279_v42  ;;  %v972_v48 = vsel %vm891_vm0, %v2845_v49, 0.0  ;;  %v908_v61 = vsel %vm892_vm4, %v2403_v4, 0.0  ;;  %v3357_v23 = vmax.f32 %v2403_v4, 0.0 }
  0xe6   : > { %v552_v43 = vadd.f32 %v2817_v14, %v551_v51  ;;  %v329_v26 = vmax.f32 %v2526_v52, 0.0  ;;  %v377_v10 = vsel %vm2853_vm9, %v374_v38, %v371_v27  ;;  %vm760_vm15 = vcmp.ge.f32.partialorder %v2598_v44, 0.0 }
  0xe7   : > { %1741 = vpow2.f32 %v296_v54  ;;  %v2886_v15 = vadd.f32 %v386_v63, %v3357_v23  ;;  %v933_v54 = vsel %vm920_vm6, %v908_v61, 0.0  ;;  %v907_v63 = vsel %vm891_vm0, %v2526_v52, 0.0 }
  0xe8   : > { %998 = vadd.xlane.f32.xlu2 %v997_v55  ;;  %1743 = vrcp.f32 %v2850_v8  ;;  %v994_v55 = vsel %vm920_vm6, %v972_v48, 0.0  ;;  %v556_v4 = vsel %vm2871_vm11, %v2817_v14, %v552_v43  ;;  %v2923_v38 = vadd.f32 %v377_v10, %v329_v26 }
  0xe9   : > { %1068 = vadd.xlane.f32.xlu0 %v2748_v37  ;;  %937 = vadd.xlane.f32.xlu1 %v2751_v39  ;;  %v559_v37 = vand.u32 2147483648, %v2760_v30  ;;  %v368_v39 = vsel %vm2836_vm5, %v365_v36, %v362_v46  ;;  %1745 = vlog2.f32 %v2850_v8  ;;  %v1038_v46 = vsel %vm893_vm3, %v2821_v0, 0.0 }
  0xea   : > { %v345_v30 = vmul.f32 -0.5, %v2831_v57  ;;  %v2891_v50 = vadd.f32 %v368_v39, %v328_v59  ;;  %vm2900_vm3 = vcmp.eq.f32.partialorder %v557_v19, 8.507059e+37  ;;  %v1064_v59 = vsel %vm920_vm6, %v1038_v46, 0.0 }
  0xeb   : > { %v560_v56 = vor.u32 1.1754944e-38, %v559_v37  ;;  %v348_v36 = vand.u32 2147483647, %v2831_v57  ;;  %v1037_v14 = vsel %vm892_vm4, %v2886_v15, 0.0  ;;  %vm523_vm4 = vweird.f32 %v2850_v8 }
  0xec   : > { %v346_v17 = vadd.f32 1.0, %v345_v30  ;;  %v1035_v27 = vsel %vm890_vm10, %v2891_v50, 0.0  ;;  %v529_v52 = vand.u32 2147483648, %v2850_v8  ;;  %v527_v19 = vand.u32 2147483647, %v2850_v8 }
  0xed   : > { %v2889_v42 = vpop.eup %1741  ;;  %v561_v1 = vsel %vm2900_vm3, %v560_v56, %v556_v4  ;;  %vm2932_vm13 = vcmp.lt.f32.partialorder %v348_v36, 0.0004427343  ;;  %v326_v46 = vmax.f32 %v2706_v47, 0.0  ;;  %v1061_v23 = vsel %vm920_vm6, %v1037_v14, 0.0 }
  0xee   : > { %v2905_v35 = vadd.f32 1.0, %v2889_v42  ;;  %v1744_v5 = vpop.eup %1743  ;;  %v354_v39 = vmul.f32 -0.5, %v2889_v42  ;;  %v776_v21 = vmul.f32 %v2744_v40, %v561_v1  ;;  %v347_v61 = vmul.f32 %v2831_v57, %v346_v17 }
  0xef   : > { %v1746_v51 = vpop.eup %1745  ;;  %v519_v34 = vmul.f32 %v1744_v5, %v2850_v8  ;;  %vm524_vm12 = vweird.f32 %v1744_v5  ;;  %v930_v30 = vsel %vm920_vm6, %v907_v63, 0.0  ;;  %v530_v4 = vor.u32 1.1754944e-38, %v529_v52 }
  0xf0   : > { %995 = vadd.xlane.f32.xlu2 %v994_v55  ;;  %1747 = vrcp.f32 %v2905_v35  ;;  %v344_v37 = vmul.f32 0.6931472, %v1746_v51  ;;  %v1055_v55 = vsel %vm920_vm6, %v1035_v27, 0.0  ;;  %vm2953_vm1 = vmor %vm523_vm4, %vm524_vm12  ;;  %vm528_vm2 = vcmp.eq.f32.partialorder %v527_v19, 8.507059e+37 }
  0xf1   : > { %1065 = vadd.xlane.f32.xlu0 %v1064_v59  ;;  %934 = vadd.xlane.f32.xlu1 %v933_v54  ;;  %v520_v43 = vsub.f32 1.0, %v519_v34  ;;  %1749 = vlog2.f32 %v2905_v35  ;;  %v355_v59 = vadd.f32 1.0, %v354_v39  ;;  %v261_v54 = vld [vmem:[%s2940_s7 + $0x78] sm:$0xff]  ;;  %v357_v17 = vand.u32 2147483647, %v2889_v42 }
  0xf2   : > { %v350_v3 = vsel %vm2932_vm13, %v347_v61, %v344_v37  ;;  %v1036_v8 = vsel %vm891_vm0, %v2923_v38, 0.0  ;;  %v2968_v51 = vsel %vm760_vm15, %v561_v1, %v776_v21  ;;  %vm538_vm5 = vweird.f32 %v2905_v35 }
  0xf3   : > { %v968_v26 = vpop.xlane.xlu2 %967  ;;  %v521_v10 = vmul.f32 %v1744_v5, %v520_v43  ;;  %v1032_v36 = vpop.xlane.xlu1 %1031  ;;  %v2970_v27 = vadd.f32 %v350_v3, %v326_v46  ;;  %v544_v19 = vand.u32 2147483648, %v2905_v35  ;;  %v356_v6 = vmul.f32 %v2889_v42, %v355_v59 }
  0xf4   : > { %v1176_v39 = vsub.f32 %v261_v54, %v1032_v36  ;;  %v542_v1 = vand.u32 2147483647, %v2905_v35  ;;  %v327_v21 = vmax.f32 %v2779_v2, 0.0  ;;  %vm2979_vm0 = vcmp.lt.f32.partialorder %v357_v17, 0.0004427343 }
  0xf5   : > { %v522_v14 = vadd.f32 %v1744_v5, %v521_v10  ;;  %3364 = vst [vmem:[#allocation10_spill] sm:$0xff] %v2970_v27  ;;  %vm758_vm9 = vcmp.ge.f32.partialorder %v2706_v47, 0.0  ;;  %vm759_vm3 = vcmp.ge.f32.partialorder %v2779_v2, 0.0  ;;  %vm1256_vm4 = vcmp.lt.s32.totalorder %v1751_v24, 16 }
  0xf6   : > { %v1748_v56 = vpop.eup %1747  ;;  %v1192_v40 = vand.u32 2147483647, %v1176_v39  ;;  %vm543_vm11 = vcmp.eq.f32.partialorder %v542_v1, 8.507059e+37  ;;  %vm889_vm12 = vcmp.eq.s32.totalorder %v2010_v16, %v2171_v12  ;;  %v260_v1 = vld [vmem:[%s2940_s7 + $0x70] sm:$0xff] }
  0xf7   : > { %v534_v63 = vmul.f32 %v1748_v56, %v2905_v35  ;;  %v526_v34 = vsel %vm2953_vm1, %v1744_v5, %v522_v14  ;;  %vm539_vm14 = vweird.f32 %v1748_v56  ;;  %v1750_v37 = vpop.eup %1749  ;;  %v971_v5 = vsel %vm890_vm10, %v2968_v51, 0.0 }
  0xf8   : > { %1056 = vadd.xlane.f32.xlu2 %v1055_v55  ;;  %v531_v43 = vsel %vm528_vm2, %v530_v4, %v526_v34  ;;  %vm2987_vm7 = vmor %vm538_vm5, %vm539_vm14  ;;  %v1144_v55 = vmul.f32 %v968_v26, %v261_v54  ;;  %v545_v4 = vor.u32 1.1754944e-38, %v544_v19  ;;  %v991_v59 = vsel %vm920_vm6, %v971_v5, 0.0 }
  0xf9   : > { %1062 = vadd.xlane.f32.xlu0 %v1061_v23  ;;  %931 = vadd.xlane.f32.xlu1 %v930_v30  ;;  %v535_v52 = vsub.f32 1.0, %v534_v63  ;;  %v353_v23 = vmul.f32 0.6931472, %v1750_v37  ;;  %v1058_v30 = vsel %vm920_vm6, %v1036_v8, 0.0  ;;  %v774_v35 = vmul.f32 %v2831_v57, %v531_v43 }
  0xfa   : > { %v1112_v57 = vmul.f32 %v1032_v36, %v1032_v36  ;;  %v1208_v26 = vmul.f32 %v1192_v40, %v1192_v40  ;;  %v906_v34 = vsel %vm890_vm10, %v2598_v44, 0.0  ;;  %vm1240_vm10 = vcmp.ge.s32.totalorder %v1751_v24, 0 }
  0xfb   : > { %v536_v48 = vmul.f32 %v1748_v56, %v535_v52  ;;  %v359_v3 = vsel %vm2979_vm0, %v356_v6, %v353_v23  ;;  %v1096_v14 = vpop.xlane.xlu2 %1095  ;;  %v3001_v47 = vsel %vm758_vm9, %v531_v43, %v774_v35  ;;  %v927_v36 = vsel %vm920_vm6, %v906_v34, 0.0  ;;  %vm1272_vm13 = vmand %vm1240_vm10, %vm1256_vm4 }
  0xfc   : > { %v2999_v17 = vadd.f32 %v359_v3, %v327_v21  ;;  %v1160_v54 = vsub.f32 %v1096_v14, %v1144_v55  ;;  %v1128_v37 = vmul.f32 %v1112_v57, %v1096_v14  ;;  %v905_v23 = vsel %vm889_vm12, %v2779_v2, 0.0 }
  0xfd   : > { %v537_v10 = vadd.f32 %v1748_v56, %v536_v48 }
  0xfe   : > { %v1224_v39 = vmul.f32 %v1208_v26, %v1160_v54 }
  0xff   : > { %v541_v63 = vsel %vm2987_vm7, %v1748_v56, %v537_v10  ;;  %v969_v56 = vsel %vm888_vm8, %v3001_v47, 0.0  ;;  %v259_v10 = vld [vmem:[%s2940_s7 + $0x68] sm:$0xff] }
 0x100   : > { %v546_v8 = vsel %vm543_vm11, %v545_v4, %v541_v63  ;;  %v985_v43 = vsel %vm920_vm6, %v969_v56, 0.0 }
 0x101   : > { %1059 = vadd.xlane.f32.xlu1 %v1058_v30  ;;  %992 = vadd.xlane.f32.xlu0 %v991_v59  ;;  %v775_v52 = vmul.f32 %v2889_v42, %v546_v8  ;;  %v1288_v42 = vsub.f32 %v1224_v39, %v1128_v37  ;;  %v924_v30 = vsel %vm920_vm6, %v905_v23, 0.0  ;;  %v1752_v59 = vld [vmem:[%s1908_s28 + $0x70] sm:$0xff] }
 0x102   : > { %vm1239_vm15 = vcmp.ge.s32.totalorder %v1752_v59, 0  ;;  %vm1255_vm1 = vcmp.lt.s32.totalorder %v1752_v59, 16 }
 0x103   : > { %v3018_v44 = vsel %vm759_vm3, %v546_v8, %v775_v52  ;;  %v1304_v6 = vsel %vm1272_vm13, %v1288_v42, 0.0  ;;  %vm1271_vm2 = vmand %vm1239_vm15, %vm1255_vm1 }
 0x104   : > { %v970_v19 = vsel %vm889_vm12, %v3018_v44, 0.0 }
 0x105   : > { %v988_v48 = vsel %vm920_vm6, %v970_v19, 0.0 }
 0x109   : > { %928 = vadd.xlane.f32.xlu0 %v927_v36  ;;  %986 = vadd.xlane.f32.xlu1 %v985_v43  ;;  %v1753_v43 = vld [vmem:[%s1908_s28 + $0x68] sm:$0xff] }
 0x10a   : > { %vm1238_vm5 = vcmp.ge.s32.totalorder %v1753_v43, 0  ;;  %vm1254_vm14 = vcmp.lt.s32.totalorder %v1753_v43, 16 }
 0x10b   : > { %vm1270_vm0 = vmand %vm1238_vm5, %vm1254_vm14 }
 0x110   : > { %1383 = vperm.xlu2 %1654, %v1304_v6  }
 0x111   : > { %989 = vadd.xlane.f32.xlu0 %v988_v48 }
 0x113   : > { %v1026_v21 = vpop.xlane.xlu2 %1025 }
 0x114   : > { %v965_v46 = vpop.xlane.xlu1 %964  ;;  %v1029_v5 = vpop.xlane.xlu0 %1028  ;;  %v1174_v26 = vsub.f32 %v259_v10, %v1026_v21  ;;  %v1110_v24 = vmul.f32 %v1026_v21, %v1026_v21 }
 0x115   : > { %v1175_v61 = vsub.f32 %v260_v1, %v1029_v5  ;;  %v1143_v55 = vmul.f32 %v965_v46, %v260_v1  ;;  %v1111_v14 = vmul.f32 %v1029_v5, %v1029_v5 }
 0x116   : > { %v1190_v2 = vand.u32 2147483647, %v1174_v26  ;;  %v255_v26 = vld [vmem:[%s2940_s7 + $0x48] sm:$0xff] }
 0x117   : > { %v1191_v35 = vand.u32 2147483647, %v1175_v61 }
 0x118   : > { %v1206_v42 = vmul.f32 %v1190_v2, %v1190_v2 }
 0x119   : > { %925 = vadd.xlane.f32.xlu0 %v924_v30  ;;  %v1207_v63 = vmul.f32 %v1191_v35, %v1191_v35 }
 0x11b   : > { %v1023_v40 = vpop.xlane.xlu2 %1022 }
 0x11c   : > { %v1093_v4 = vpop.xlane.xlu0 %1092  ;;  %v962_v3 = vpop.xlane.xlu1 %961 }
 0x11d   : > { %v1159_v57 = vsub.f32 %v1093_v4, %v1143_v55  ;;  %v1127_v54 = vmul.f32 %v1111_v14, %v1093_v4  ;;  %v1142_v56 = vmul.f32 %v962_v3, %v259_v10  ;;  %v921_v10 = vsel %vm920_vm6, %v2811_v62, 0.0  ;;  %v258_v55 = vld [vmem:[%s2940_s7 + $0x60] sm:$0xff] }
 0x11e   : > { %v1173_v14 = vsub.f32 %v258_v55, %v1023_v40  ;;  %v1109_v62 = vmul.f32 %v1023_v40, %v1023_v40 }
 0x11f   : > { %v1223_v8 = vmul.f32 %v1207_v63, %v1159_v57 }
 0x120   : > { %v1189_v57 = vand.u32 2147483647, %v1173_v14 }
 0x121   : > { %v1287_v34 = vsub.f32 %v1223_v8, %v1127_v54 }
 0x123   : > { %v3033_v52 = vpop.xlane.xlu2 %1019  ;;  %v1303_v37 = vsel %vm1271_vm2, %v1287_v34, 0.0 }
 0x124   : > { %v1090_v39 = vpop.xlane.xlu0 %1089  ;;  %v959_v36 = vpop.xlane.xlu1 %958  ;;  %1378 = vperm.xlu1 %1653, %v1303_v37  }
 0x125   : > { %v1158_v19 = vsub.f32 %v1090_v39, %v1142_v56  ;;  %v1126_v6 = vmul.f32 %v1110_v24, %v1090_v39  ;;  %v1141_v63 = vmul.f32 %v959_v36, %v258_v55  ;;  %v1205_v56 = vmul.f32 %v1189_v57, %v1189_v57 }
 0x126   : > { %v1033_v24 = vsel %vm888_vm8, %v2970_v27, 0.0 }
 0x127   : > { %v1222_v48 = vmul.f32 %v1206_v42, %v1158_v19  ;;  %v1754_v19 = vld [vmem:[%s1908_s28 + $0x60] sm:$0xff] }
 0x128   : > { %vm1237_vm7 = vcmp.ge.s32.totalorder %v1754_v19, 0  ;;  %vm1253_vm9 = vcmp.lt.s32.totalorder %v1754_v19, 16 }
 0x129   : > { %v1286_v1 = vsub.f32 %v1222_v48, %v1126_v6  ;;  %v254_v6 = vld [vmem:[%s2940_s7 + $0x40] sm:$0xff]  ;;  %vm1269_vm11 = vmand %vm1237_vm7, %vm1253_vm9 }
 0x12b   : > { %v3036_v46 = vpop.xlane.xlu2 %1016  ;;  %v1302_v5 = vsel %vm1270_vm0, %v1286_v1, 0.0 }
 0x12c   : > { %v1087_v61 = vpop.xlane.xlu0 %1086  ;;  %v3038_v23 = vpop.xlane.xlu1 %955 }
 0x12d   : > { %1373 = vperm.xlu0 %1652, %v1302_v5   ;;  %v1157_v8 = vsub.f32 %v1087_v61, %v1141_v63  ;;  %v1125_v43 = vmul.f32 %v1109_v62, %v1087_v61 }
 0x12f   : > { %v1221_v39 = vmul.f32 %v1205_v56, %v1157_v8  ;;  %v256_v8 = vld [vmem:[%s2940_s7 + $0x50] sm:$0xff] }
 0x131   : > { %v1285_v61 = vsub.f32 %v1221_v39, %v1125_v43  ;;  %v252_v43 = vld [vmem:[%s2940_s7 + $0x30] sm:$0xff] }
 0x133   : > { %v1014_v30 = vpop.xlane.xlu2 %1013  ;;  %v1301_v57 = vsel %vm1269_vm11, %v1285_v61, 0.0 }
 0x134   : > { %v3040_v35 = vpop.xlane.xlu0 %1083  ;;  %v3042_v21 = vpop.xlane.xlu1 %952  ;;  %v1170_v37 = vsub.f32 %v255_v26, %v1014_v30  ;;  %v1106_v14 = vmul.f32 %v1014_v30, %v1014_v30  ;;  %v1034_v30 = vsel %vm889_vm12, %v2999_v17, 0.0 }
 0x135   : > { %v1052_v61 = vsel %vm920_vm6, %v1034_v30, 0.0  ;;  %v1139_v30 = vmul.f32 %v3042_v21, %v256_v8 }
 0x136   : > { %v1186_v36 = vand.u32 2147483647, %v1170_v37 }
 0x138   : > { %v1202_v32 = vmul.f32 %v1186_v36, %v1186_v36 }
 0x139   : > { %922 = vadd.xlane.f32.xlu2 %v921_v10  ;;  %v1049_v10 = vsel %vm920_vm6, %v1033_v24, 0.0 }
 0x13b   : > { %v1011_v4 = vpop.xlane.xlu2 %1010 }
 0x13c   : > { %v3047_v3 = vpop.xlane.xlu0 %1080  ;;  %v950_v59 = vpop.xlane.xlu1 %949  ;;  %v1169_v55 = vsub.f32 %v254_v6, %v1011_v4 }
 0x13d   : > { %v1138_v42 = vmul.f32 %v950_v59, %v255_v26  ;;  %v257_v59 = vld [vmem:[%s2940_s7 + $0x58] sm:$0xff]  ;;  %v1755_v26 = vld [vmem:[%s1908_s28 + $0x48] sm:$0xff] }
 0x13e   : > { %vm1234_vm8 = vcmp.ge.s32.totalorder %v1755_v26, 0  ;;  %v1185_v62 = vand.u32 2147483647, %v1169_v55  ;;  %vm1250_vm3 = vcmp.lt.s32.totalorder %v1755_v26, 16  ;;  %v1172_v39 = vsub.f32 %v257_v59, %v3033_v52 }
 0x13f   : > { %vm1266_vm10 = vmand %vm1234_vm8, %vm1250_vm3 }
 0x140   : > { %v1188_v12 = vand.u32 2147483647, %v1172_v39  ;;  %v1108_v39 = vmul.f32 %v3033_v52, %v3033_v52 }
 0x142   : > { %v1204_v27 = vmul.f32 %v1188_v12, %v1188_v12  ;;  %v1124_v21 = vmul.f32 %v1108_v39, %v3040_v35 }
 0x143   : > { %v3050_v54 = vpop.xlane.xlu2 %1007 }
 0x144   : > { %v1078_v2 = vpop.xlane.xlu0 %1077  ;;  %v947_v34 = vpop.xlane.xlu1 %946 }
 0x145   : > { %v1154_v1 = vsub.f32 %v1078_v2, %v1138_v42  ;;  %v1122_v56 = vmul.f32 %v1106_v14, %v1078_v2  ;;  %v1137_v37 = vmul.f32 %v947_v34, %v254_v6  ;;  %v1171_v2 = vsub.f32 %v256_v8, %v3036_v46  ;;  %v253_v14 = vld [vmem:[%s2940_s7 + $0x38] sm:$0xff] }
 0x146   : > { %v1201_v34 = vmul.f32 %v1185_v62, %v1185_v62  ;;  %v1756_v62 = vld [vmem:[%s1908_s28 + $0x40] sm:$0xff] }
 0x147   : > { %v1218_v63 = vmul.f32 %v1202_v32, %v1154_v1  ;;  %v1105_v32 = vmul.f32 %v1011_v4, %v1011_v4  ;;  %vm1233_vm4 = vcmp.ge.s32.totalorder %v1756_v62, 0  ;;  %vm1249_vm12 = vcmp.lt.s32.totalorder %v1756_v62, 16 }
 0x148   : > { %vm1265_vm13 = vmand %vm1233_vm4, %vm1249_vm12 }
 0x149   : > { %v1282_v1 = vsub.f32 %v1218_v63, %v1122_v56  ;;  %v1187_v56 = vand.u32 2147483647, %v1171_v2 }
 0x14b   : > { %v3058_v48 = vpop.xlane.xlu2 %1004  ;;  %v1203_v8 = vmul.f32 %v1187_v56, %v1187_v56 }
 0x14c   : > { %v1075_v40 = vpop.xlane.xlu0 %1074  ;;  %v3060_v5 = vpop.xlane.xlu1 %943  ;;  %v1167_v6 = vsub.f32 %v252_v43, %v3058_v48  ;;  %v1103_v52 = vmul.f32 %v3058_v48, %v3058_v48  ;;  %v250_v48 = vld [vmem:[%s2940_s7 + $0x20] sm:$0xff] }
 0x14d   : > { %v1153_v42 = vsub.f32 %v1075_v40, %v1137_v37  ;;  %v1121_v26 = vmul.f32 %v1105_v32, %v1075_v40 }
 0x14e   : > { %1050 = vadd.xlane.f32.xlu1 %v1049_v10  ;;  %v1140_v10 = vmul.f32 %v3038_v23, %v257_v59  ;;  %v1183_v37 = vand.u32 2147483647, %v1167_v6  ;;  %v1168_v23 = vsub.f32 %v253_v14, %v3050_v54 }
 0x14f   : > { %v1217_v55 = vmul.f32 %v1201_v34, %v1153_v42  ;;  %v1155_v34 = vsub.f32 %v3047_v3, %v1139_v30  ;;  %v1759_v30 = vld [vmem:[%s1908_s28 + $0x50] sm:$0xff] }
 0x150   : > { %v1156_v63 = vsub.f32 %v3040_v35, %v1140_v10  ;;  %v1757_v10 = vld [vmem:[%s1908_s28 + $0x58] sm:$0xff]  ;;  %v1107_v35 = vmul.f32 %v3036_v46, %v3036_v46  ;;  %vm1235_vm0 = vcmp.ge.s32.totalorder %v1759_v30, 0  ;;  %vm1251_vm7 = vcmp.lt.s32.totalorder %v1759_v30, 16 }
 0x151   : > { %1368 = vperm.xlu2 %1654, %v1301_v57   ;;  %v1298_v57 = vsel %vm1266_vm10, %v1282_v1, 0.0  ;;  %v1281_v40 = vsub.f32 %v1217_v55, %v1121_v26  ;;  %vm1236_vm15 = vcmp.ge.s32.totalorder %v1757_v10, 0  ;;  %vm1252_vm1 = vcmp.lt.s32.totalorder %v1757_v10, 16  ;;  %vm1267_vm11 = vmand %vm1235_vm0, %vm1251_vm7 }
 0x152   : > { %v1220_v2 = vmul.f32 %v1204_v27, %v1156_v63  ;;  %v1136_v27 = vmul.f32 %v3060_v5, %v253_v14  ;;  %v1123_v5 = vmul.f32 %v1107_v35, %v3047_v3  ;;  %vm1268_vm14 = vmand %vm1236_vm15, %vm1252_vm1 }
 0x153   : > { %v3068_v24 = vpop.xlane.xlu2 %1001  ;;  %v1297_v55 = vsel %vm1265_vm13, %v1281_v40, 0.0  ;;  %v1104_v40 = vmul.f32 %v3050_v54, %v3050_v54 }
 0x154   : > { %v3074_v36 = vpop.xlane.xlu0 %1071  ;;  %v941_v19 = vpop.xlane.xlu1 %940  ;;  %v1284_v63 = vsub.f32 %v1220_v2, %v1124_v21 }
 0x155   : > { %v1135_v59 = vmul.f32 %v941_v19, %v252_v43  ;;  %v1199_v43 = vmul.f32 %v1183_v37, %v1183_v37  ;;  %v1184_v19 = vand.u32 2147483647, %v1168_v23  ;;  %v1152_v56 = vsub.f32 %v3074_v36, %v1136_v27  ;;  %v1758_v37 = vld [vmem:[%s1908_s28 + $0x30] sm:$0xff]  ;;  %v249_v27 = vld [vmem:[%s2940_s7 + $0x18] sm:$0xff] }
 0x156   : > { %vm1231_vm2 = vcmp.ge.s32.totalorder %v1758_v37, 0  ;;  %vm1247_vm5 = vcmp.lt.s32.totalorder %v1758_v37, 16 }
 0x157   : > { %1053 = vadd.xlane.f32.xlu0 %v1052_v61  ;;  %v251_v61 = vld [vmem:[%s2940_s7 + $0x28] sm:$0xff]  ;;  %v1200_v14 = vmul.f32 %v1184_v19, %v1184_v19  ;;  %vm1263_vm9 = vmand %vm1231_vm2, %vm1247_vm5  ;;  %v1102_v19 = vmul.f32 %v3068_v24, %v3068_v24  ;;  %vm1305_vm5 = vcmp.eq.s32.totalorder %v2010_v16, 0 }
 0x158   : > { %v1166_v32 = vsub.f32 %v251_v61, %v3068_v24 }
 0x159   : > { %1353 = vperm.xlu2 %1654, %v1298_v57   ;;  %v1219_v57 = vmul.f32 %v1203_v8, %v1155_v34  ;;  %v1216_v2 = vmul.f32 %v1200_v14, %v1152_v56  ;;  %v1761_v56 = vld [vmem:[%s1908_s28 + $0x28] sm:$0xff] }
 0x15a   : > { %v1182_v23 = vand.u32 2147483647, %v1166_v32  ;;  %vm1230_vm4 = vcmp.ge.s32.totalorder %v1761_v56, 0  ;;  %vm1246_vm12 = vcmp.lt.s32.totalorder %v1761_v56, 16 }
 0x15b   : > { %v3086_v4 = vpop.xlane.xlu2 %998  ;;  %v1283_v21 = vsub.f32 %v1219_v57, %v1123_v5  ;;  %vm1262_vm13 = vmand %vm1230_vm4, %vm1246_vm12 }
 0x15c   : > { %v1069_v42 = vpop.xlane.xlu0 %1068  ;;  %v938_v1 = vpop.xlane.xlu1 %937  ;;  %v1165_v3 = vsub.f32 %v250_v48, %v3086_v4  ;;  %v1198_v8 = vmul.f32 %v1182_v23, %v1182_v23  ;;  %v1762_v23 = vld [vmem:[%s1908_s28 + $0x20] sm:$0xff] }
 0x15d   : > { %v1151_v6 = vsub.f32 %v1069_v42, %v1135_v59  ;;  %v1119_v26 = vmul.f32 %v1103_v52, %v1069_v42  ;;  %v1134_v46 = vmul.f32 %v938_v1, %v251_v61  ;;  %v1760_v1 = vld [vmem:[%s1908_s28 + $0x38] sm:$0xff]  ;;  %v1120_v61 = vmul.f32 %v1104_v40, %v3074_v36 }
 0x15e   : > { %vm1232_vm8 = vcmp.ge.s32.totalorder %v1760_v1, 0  ;;  %vm1248_vm3 = vcmp.lt.s32.totalorder %v1760_v1, 16  ;;  %v1181_v54 = vand.u32 2147483647, %v1165_v3  ;;  %v1299_v10 = vsel %vm1267_vm11, %v1283_v21, 0.0  ;;  %v1763_v21 = vld [vmem:[%s1908_s28 + $0x18] sm:$0xff] }
 0x15f   : > { %v1215_v12 = vmul.f32 %v1199_v43, %v1151_v6  ;;  %v1300_v6 = vsel %vm1268_vm14, %v1284_v63, 0.0  ;;  %vm1264_vm10 = vmand %vm1232_vm8, %vm1248_vm3  ;;  %v821_v36 = vmul.f32 %v2015_v22, %v2015_v22  ;;  %vm1229_vm15 = vcmp.ge.s32.totalorder %v1762_v23, 0 }
 0x160   : > { %v1197_v24 = vmul.f32 %v1181_v54, %v1181_v54  ;;  %vm1245_vm1 = vcmp.lt.s32.totalorder %v1762_v23, 16  ;;  %vm1228_vm14 = vcmp.ge.s32.totalorder %v1763_v21, 0  ;;  %vm1244_vm0 = vcmp.lt.s32.totalorder %v1763_v21, 16 }
 0x161   : > { %1348 = vperm.xlu2 %1654, %v1297_v55   ;;  %v1279_v42 = vsub.f32 %v1215_v12, %v1119_v26  ;;  %v1280_v12 = vsub.f32 %v1216_v2, %v1120_v61  ;;  %vm1261_vm2 = vmand %vm1229_vm15, %vm1245_vm1 }
 0x162   : > { %vm1260_vm7 = vmand %vm1228_vm14, %vm1244_vm0 }
 0x163   : > { %v3105_v62 = vpop.xlane.xlu2 %995  ;;  %v1295_v43 = vsel %vm1263_vm9, %v1279_v42, 0.0  ;;  %v1296_v5 = vsel %vm1264_vm10, %v1280_v12, 0.0 }
 0x164   : > { %v1066_v59 = vpop.xlane.xlu0 %1065  ;;  %v935_v39 = vpop.xlane.xlu1 %934  ;;  %v1164_v37 = vsub.f32 %v249_v27, %v3105_v62 }
 0x165   : > { %v1150_v34 = vsub.f32 %v1066_v59, %v1134_v46  ;;  %v1133_v32 = vmul.f32 %v935_v39, %v250_v48  ;;  %v1118_v35 = vmul.f32 %v1102_v19, %v1066_v59  ;;  %v1101_v48 = vmul.f32 %v3086_v4, %v3086_v4 }
 0x166   : > { %v837_v46 = vmul.f32 %v821_v36, %v2034_v33  ;;  %v1180_v59 = vand.u32 2147483647, %v1164_v37  ;;  %v1100_v33 = vmul.f32 %v3105_v62, %v3105_v62 }
 0x167   : > { %1363 = vperm.xlu1 %1653, %v1300_v6   ;;  %v1214_v52 = vmul.f32 %v1198_v8, %v1150_v34  ;;  %v248_v6 = vld [vmem:[%s2940_s7 + $0x10] sm:$0xff] }
 0x168   : > { %v1196_v1 = vmul.f32 %v1180_v59, %v1180_v59  ;;  %v819_v59 = vmul.f32 %v2165_v7, %v2165_v7  ;;  %v818_v7 = vmul.f32 %v2141_v60, %v2141_v60 }
 0x169   : > { %1338 = vperm.xlu2 %1654, %v1295_v43   ;;  %v1278_v14 = vsub.f32 %v1214_v52, %v1118_v35 }
 0x16b   : > { %1358 = vperm.xlu0 %1652, %v1299_v10   ;;  %v3121_v55 = vpop.xlane.xlu2 %1056  ;;  %v1294_v39 = vsel %vm1262_vm13, %v1278_v14, 0.0  ;;  %v820_v14 = vmul.f32 %v2153_v45, %v2153_v45 }
 0x16c   : > { %v1063_v57 = vpop.xlane.xlu0 %1062  ;;  %v932_v63 = vpop.xlane.xlu1 %931 }
 0x16d   : > { %v1149_v26 = vsub.f32 %v1063_v57, %v1133_v32  ;;  %v1117_v22 = vmul.f32 %v1101_v48, %v1063_v57  ;;  %v1132_v40 = vmul.f32 %v932_v63, %v249_v27  ;;  %v1764_v63 = vld [vmem:[%s1908_s28 + $0x10] sm:$0xff] }
 0x16e   : > { %vm1227_vm9 = vcmp.ge.s32.totalorder %v1764_v63, 0  ;;  %vm1243_vm11 = vcmp.lt.s32.totalorder %v1764_v63, 16  ;;  %v1766_v63 = vld [vmem:[%s1908_s28 + $0x8] sm:$0xff] }
 0x16f   : > { %v1213_v30 = vmul.f32 %v1197_v24, %v1149_v26  ;;  %1343 = vperm.xlu1 %1653, %v1296_v5   ;;  %vm1259_vm8 = vmand %vm1227_vm9, %vm1243_vm11  ;;  %vm1226_vm12 = vcmp.ge.s32.totalorder %v1766_v63, 0  ;;  %vm1242_vm13 = vcmp.lt.s32.totalorder %v1766_v63, 16 }
 0x170   : > { %vm1258_vm15 = vmand %vm1226_vm12, %vm1242_vm13 }
 0x171   : > { %v1277_v42 = vsub.f32 %v1213_v30, %v1117_v22  ;;  %v836_v30 = vmul.f32 %v820_v14, %v2173_v13 }
 0x173   : > { %1333 = vperm.xlu0 %1652, %v1294_v39   ;;  %v1384_v3 = vpop.permute.xlu2 %1383  ;;  %v1293_v8 = vsel %vm1261_vm2, %v1277_v42, 0.0  ;;  %v835_v39 = vmul.f32 %v819_v59, %v2186_v25 }
 0x174   : > { %v1060_v4 = vpop.xlane.xlu1 %1059  ;;  %v993_v2 = vpop.xlane.xlu0 %992  ;;  %v1401_v34 = vadd.f32 %v1384_v3, %v837_v46  ;;  %v834_v3 = vmul.f32 %v818_v7, %v2183_v20 }
 0x175   : > { %v1148_v61 = vsub.f32 %v1060_v4, %v1132_v40  ;;  %v1116_v54 = vmul.f32 %v1100_v33, %v1060_v4  ;;  %v1163_v52 = vsub.f32 %v248_v6, %v993_v2  ;;  %v1099_v62 = vmul.f32 %v993_v2, %v993_v2  ;;  %v247_v33 = vld [vmem:[%s2940_s7 + $0x8] sm:$0xff] }
 0x176   : > { %v1417_v43 = vsel %vm1305_vm5, %v1401_v34, %v837_v46  ;;  %v246_v34 = vld [vmem:[%s2940_s7] sm:$0xff] }
 0x177   : > { %v1212_v19 = vmul.f32 %v1196_v1, %v1148_v61  ;;  %1328 = vperm.xlu1 %1653, %v1293_v8   ;;  %1592 = vmatpush.xpose.msk.msra.mxu0 %vm920_vm6, %v1417_v43  ;;  %v1179_v27 = vand.u32 2147483647, %v1163_v52  ;;  %v1115_v56 = vmul.f32 %v1099_v62, %v3121_v55 }
 0x179   : > { %v1276_v10 = vsub.f32 %v1212_v19, %v1116_v54  ;;  %v1195_v35 = vmul.f32 %v1179_v27, %v1179_v27  ;;  %v1765_v19 = vld [vmem:[%s1908_s28] sm:$0xff] }
 0x17a   : > { %vm1225_vm3 = vcmp.ge.s32.totalorder %v1765_v19, 0  ;;  %vm1241_vm10 = vcmp.lt.s32.totalorder %v1765_v19, 16 }
 0x17b   : > { %v1292_v12 = vsel %vm1260_vm7, %v1276_v10, 0.0  ;;  %vm1257_vm4 = vmand %vm1225_vm3, %vm1241_vm10 }
 0x17c   : > { %v929_v32 = vpop.xlane.xlu0 %928  ;;  %1323 = vperm.xlu2 %1654, %v1292_v12   ;;  %v987_v5 = vpop.xlane.xlu1 %986 }
 0x17d   : > { %v1131_v36 = vmul.f32 %v929_v32, %v248_v6  ;;  %v1161_v6 = vsub.f32 %v246_v34, %v987_v5  ;;  %v1097_v61 = vmul.f32 %v987_v5, %v987_v5  ;;  %v817_v5 = vmul.f32 %v2334_v11, %v2334_v11 }
 0x17f   : > { %v1147_v57 = vsub.f32 %v3121_v55, %v1131_v36  ;;  %v1177_v21 = vand.u32 2147483647, %v1161_v6 }
 0x181   : > { %v1211_v24 = vmul.f32 %v1195_v35, %v1147_v57  ;;  %v1193_v43 = vmul.f32 %v1177_v21, %v1177_v21  ;;  %v3372_v21 = vld [vmem:[#allocation8_spill] sm:$0xff] }
 0x183   : > { %v1275_v26 = vsub.f32 %v1211_v24, %v1115_v56 }
 0x184   : > { %v990_v48 = vpop.xlane.xlu0 %989 }
 0x185   : > { %v1291_v37 = vsel %vm1259_vm8, %v1275_v26, 0.0  ;;  %v1162_v60 = vsub.f32 %v247_v33, %v990_v48  ;;  %v1098_v62 = vmul.f32 %v990_v48, %v990_v48  ;;  %v833_v48 = vmul.f32 %v817_v5, %v2397_v28 }
 0x186   : > { %1318 = vperm.xlu0 %1652, %v1291_v37  }
 0x187   : > { %v1178_v27 = vand.u32 2147483647, %v1162_v60 }
 0x189   : > { %v1194_v35 = vmul.f32 %v1178_v27, %v1178_v27 }
 0x18c   : > { %v926_v46 = vpop.xlane.xlu0 %925 }
 0x18d   : > { %v1130_v32 = vmul.f32 %v926_v46, %v247_v33 }
 0x196   : > { %v1379_v22 = vpop.permute.xlu1 %1378 }
 0x197   : > { %v1400_v23 = vadd.f32 %v1379_v22, %v836_v30  ;;  %v815_v22 = vmul.f32 %v2357_v41, %v2357_v41 }
 0x199   : > { %v1416_v55 = vsel %vm1305_vm5, %v1400_v23, %v836_v30  ;;  %v816_v30 = vmul.f32 %v2378_v31, %v2378_v31 }
 0x19a   : > { %1593 = vmatpush.xpose.msk.msra.mxu0 %vm920_vm6, %v1416_v55  ;;  %v3369_v55 = vld [vmem:[#allocation6_spill] sm:$0xff] }
 0x19b   : > { %v832_v59 = vmul.f32 %v816_v30, %v2453_v53 }
 0x19f   : > { %v1374_v42 = vpop.permute.xlu0 %1373 }
 0x1a0   : > { %v1399_v40 = vadd.f32 %v1374_v42, %v835_v39  ;;  %v3370_v42 = vld [vmem:[#allocation5_spill] sm:$0xff] }
 0x1a2   : > { %v1415_v45 = vsel %vm1305_vm5, %v1399_v40, %v835_v39  ;;  %v814_v39 = vmul.f32 %v3369_v55, %v3369_v55  ;;  %v831_v40 = vmul.f32 %v815_v22, %v3370_v42 }
 0x1a3   : > { %1594 = vmatpush.xpose.msk.msra.mxu0 %vm920_vm6, %v1415_v45 }
 0x1ac   : > { %v923_v13 = vpop.xlane.xlu2 %922 }
 0x1ad   : > { %v1129_v1 = vmul.f32 %v923_v13, %v246_v34  ;;  %v3371_v13 = vld [vmem:[#allocation7_spill] sm:$0xff] }
 0x1ae   : > { %v813_v41 = vmul.f32 %v3371_v13, %v3371_v13 }
 0x1b0   : > { %v829_v34 = vmul.f32 %v813_v41, %v2675_v18 }
 0x1b4   : > { %v1369_v4 = vpop.permute.xlu2 %1368 }
 0x1b5   : > { %v1398_v2 = vadd.f32 %v1369_v4, %v834_v3  ;;  %v812_v4 = vmul.f32 %v2666_v9, %v2666_v9  ;;  %v3373_v9 = vld [vmem:[#allocation9_spill] sm:$0xff] }
 0x1b6   : > { %v810_v18 = vmul.f32 %v3373_v9, %v3373_v9 }
 0x1b7   : > { %v1414_v25 = vsel %vm1305_vm5, %v1398_v2, %v834_v3  ;;  %v830_v3 = vmul.f32 %v814_v39, %v2658_v58  ;;  %v811_v58 = vmul.f32 %v2736_v29, %v2736_v29  ;;  %v828_v33 = vmul.f32 %v812_v4, %v3372_v21 }
 0x1b8   : > { %1595 = vmatpush.xpose.msk.msra.mxu0 %vm920_vm6, %v1414_v25  ;;  %v809_v29 = vmul.f32 %v2845_v49, %v2845_v49 }
 0x1bc   : > { %v1354_v14 = vpop.permute.xlu2 %1353 }
 0x1bd   : > { %v1395_v7 = vadd.f32 %v1354_v14, %v831_v40 }
 0x1bf   : > { %v1411_v25 = vsel %vm1305_vm5, %v1395_v7, %v831_v40 }
 0x1c1   : > { %v1051_v8 = vpop.xlane.xlu1 %1050 }
 0x1c2   : > { %v1145_v54 = vsub.f32 %v1051_v8, %v1129_v1  ;;  %v1113_v20 = vmul.f32 %v1097_v61, %v1051_v8 }
 0x1c4   : > { %v1209_v52 = vmul.f32 %v1193_v43, %v1145_v54  ;;  %v1349_v28 = vpop.permute.xlu2 %1348  ;;  %v827_v54 = vmul.f32 %v811_v58, %v2821_v0  ;;  %v808_v0 = vmul.f32 %v2968_v51, %v2968_v51 }
 0x1c5   : > { %v1394_v2 = vadd.f32 %v1349_v28, %v830_v3 }
 0x1c6   : > { %v1273_v10 = vsub.f32 %v1209_v52, %v1113_v20  ;;  %v826_v52 = vmul.f32 %v810_v18, %v2886_v15  ;;  %v824_v15 = vmul.f32 %v808_v0, %v2891_v50  ;;  %v807_v50 = vmul.f32 %v3018_v44, %v3018_v44 }
 0x1c7   : > { %v1410_v61 = vsel %vm1305_vm5, %v1394_v2, %v830_v3  ;;  %v1832_v44 = vmov 1.0  }
 0x1c8   : > { %v1289_v12 = vsel %vm1257_vm4, %v1273_v10, 0.0 }
 0x1c9   : > { %1308 = vperm.xlu2 %1654, %v1289_v12   ;;  %v825_v12 = vmul.f32 %v809_v29, %v2923_v38 }
 0x1ca   : > { %v1054_v36 = vpop.xlane.xlu0 %1053 }
 0x1cb   : > { %v1146_v57 = vsub.f32 %v1054_v36, %v1130_v32  ;;  %v1114_v56 = vmul.f32 %v1098_v62, %v1054_v36 }
 0x1cc   : > { %v1339_v8 = vpop.permute.xlu2 %1338 }
 0x1cd   : > { %v1210_v24 = vmul.f32 %v1194_v35, %v1146_v57  ;;  %v1392_v43 = vadd.f32 %v1339_v8, %v828_v33 }
 0x1cf   : > { %v1274_v26 = vsub.f32 %v1210_v24, %v1114_v56  ;;  %v1408_v10 = vsel %vm1305_vm5, %v1392_v43, %v828_v33  ;;  %v806_v56 = vmul.f32 %v3001_v47, %v3001_v47  ;;  %v823_v24 = vmul.f32 %v807_v50, %v2999_v17 }
 0x1d1   : > { %v1290_v37 = vsel %vm1258_vm15, %v1274_v26, 0.0  ;;  %v3374_v26 = vld [vmem:[#allocation10_spill] sm:$0xff] }
 0x1d2   : > { %1313 = vperm.xlu1 %1653, %v1290_v37   ;;  %v822_v37 = vmul.f32 %v806_v56, %v3374_v26 }
 0x1d6   : > { %v1324_v36 = vpop.permute.xlu2 %1323 }
 0x1d7   : > { %v1389_v49 = vadd.f32 %v1324_v36, %v825_v12 }
 0x1d9   : > { %v1364_v46 = vpop.permute.xlu1 %1363  ;;  %v1405_v38 = vsel %vm1305_vm5, %v1389_v49, %v825_v12 }
 0x1da   : > { %v1397_v23 = vadd.f32 %v1364_v46, %v833_v48 }
 0x1dc   : > { %v1413_v11 = vsel %vm1305_vm5, %v1397_v23, %v833_v48 }
 0x1dd   : > { %v1359_v45 = vpop.permute.xlu0 %1358  ;;  %1596 = vmatpush.xpose.msk.msra.mxu0 %vm920_vm6, %v1413_v11 }
 0x1de   : > { %v1396_v31 = vadd.f32 %v1359_v45, %v832_v59 }
 0x1e0   : > { %v1412_v53 = vsel %vm1305_vm5, %v1396_v31, %v832_v59 }
 0x1e1   : > { %1597 = vmatpush.xpose.msk.msra.mxu0 %vm920_vm6, %v1412_v53  ;;  %v1344_v6 = vpop.permute.xlu1 %1343 }
 0x1e2   : > { %v1393_v1 = vadd.f32 %v1344_v6, %v829_v34 }
 0x1e4   : > { %v1409_v19 = vsel %vm1305_vm5, %v1393_v1, %v829_v34 }
 0x1e5   : > { %1598 = vmatpush.xpose.msk.msra.mxu0 %vm920_vm6, %v1411_v25  ;;  %v1334_v60 = vpop.permute.xlu0 %1333 }
 0x1e6   : > { %v1391_v20 = vadd.f32 %v1334_v60, %v827_v54 }
 0x1e8   : > { %v1407_v62 = vsel %vm1305_vm5, %v1391_v20, %v827_v54 }
 0x1e9   : > { %1599 = vmatpush.xpose.msk.msra.mxu0 %vm920_vm6, %v1410_v61  ;;  %v1329_v27 = vpop.permute.xlu1 %1328 }
 0x1ea   : > { %v1390_v32 = vadd.f32 %v1329_v27, %v826_v52 }
 0x1ec   : > { %v1406_v35 = vsel %vm1305_vm5, %v1390_v32, %v826_v52 }
 0x1ed   : > { %1600 = vmatpush.xpose.msk.msra.mxu0 %vm920_vm6, %v1409_v19 }
 0x1f1   : > { %1601 = vmatpush.xpose.msk.msra.mxu0 %vm920_vm6, %v1408_v10 }
 0x1f5   : > { %1602 = vmatpush.xpose.msk.msra.mxu0 %vm920_vm6, %v1407_v62 }
 0x1f8   : > { %v1319_v57 = vpop.permute.xlu0 %1318 }
 0x1f9   : > { %1603 = vmatpush.xpose.msk.msra.mxu0 %vm920_vm6, %v1406_v35  ;;  %v1388_v63 = vadd.f32 %v1319_v57, %v824_v15 }
 0x1fb   : > { %v1404_v51 = vsel %vm1305_vm5, %v1388_v63, %v824_v15 }
 0x1fd   : > { %1604 = vmatpush.xpose.msk.msra.mxu0 %vm920_vm6, %v1405_v38 }
 0x201   : > { %1605 = vmatpush.xpose.msk.msra.mxu0 %vm920_vm6, %v1404_v51 }
 0x223   : > { %v1309_v5 = vpop.permute.xlu2 %1308 }
 0x224   : > { %v1386_v48 = vadd.f32 %v1309_v5, %v822_v37 }
 0x226   : > { %v1402_v46 = vsel %vm1305_vm5, %v1386_v48, %v822_v37 }
 0x244   : > { %v1314_v14 = vpop.permute.xlu1 %1313 }
 0x245   : > { %v1387_v30 = vadd.f32 %v1314_v14, %v823_v24 }
 0x247   : > { %v1403_v22 = vsel %vm1305_vm5, %v1387_v30, %v823_v24 }
 0x248   : > { %1606 = vmatpush.xpose.msk.msra.mxu0 %vm920_vm6, %v1403_v22 }
 0x24c   : > { %1607 = vmatpush.xpose.msk.msra.mxu0 %vm920_vm6, %v1402_v46 }
 0x24f   : > { %1608 = vmatmul.msk.f32.vlgmr.msra.gmra.mxu0 %vm920_vm6, %v1832_v44 }
 0x2cc   : > { %v1486_v17 = vpop.f32.mrf.mxu0 }
 0x2cd   : > { %1489 = vst [vmem:[%s195_s17] sm:$0x1] %v1486_v17 }
 0x2ce   : > { %1794 = shalt.err (!%p1791_p3)
}
 0x2cf   : > { %1611 = dma.vmem_to_hbm [thread:$0]  (%p1891_p5), %s1502_s19, 16, %s1504_s20, %s1491_s24  }
 0x2d0 PF: > { %p1617_p4 = scmp.ge.s32.totalorder %s1829_s15, 2  ;;  %s1515_s4 = sand.u32 1, %s1817_s12  }
 0x2d1   : > { %s1516_s5 = scalar_lea.sflag [#allocation3], %s1515_s4 }
 0x2d2   : > { %p1614_p7 = pnand %p1617_p4, %p1895_p6 }
 0x2d4   : > { %p1615_p8 = pneg %p1614_p7 }
 0x2d6   : > { %1812 = dma.done.wait (%p1615_p8), %s1516_s5, 16  }
 0x2d7   : > { %1814 = vsyncadd (%p1615_p8), %s1516_s5, 4294967280  ;;  %p13_p9 = scmp.ge.s32.totalorder %s1878_s18, 5   ;;  %s3375_s12 = smov %s1821_s13 }
 0x2d8   : > { %s3376_s13 = smov %s1825_s14  ;;  %s3377_s14 = smov %s1889_s21 }
 0x2d9   : > { %s3378_s15 = smov %s1878_s18  ;;  %15 = sbr.rel (!%p13_p9) target bundleno = 3 (0x3), region = 73 }
 0x2de   :  { %1521 = vsyncpa [#allocation3], 1 }
 0x2df   :  { %1523 = vsyncpa [#allocation3 + $0x1], 1 }

</bundles_post_ra>
